<compile_context>
chip_gen: v6e
topology: v6e:2x2x1
jax: 0.10.0
libtpu: 0.0.40
codegen_flags: <defaults>
</compile_context>

<pallas_src>
import functools

import jax
import jax.numpy as jnp
import numpy as np
from jax.experimental import pallas as pl
from jax.experimental.pallas import tpu as pltpu


# ----------------------------- Pallas kernel --------------------------------


def _layer_norm(y, w, b, eps=1e-5):
    mu = jnp.mean(y, axis=-1, keepdims=True)
    var = jnp.mean((y - mu) ** 2, axis=-1, keepdims=True)
    return (y - mu) * jax.lax.rsqrt(var + eps) * w + b


def _deformer_kernel(x_ref, pw_ref, pb_ref,
                     wq_ref, wk_ref, wv_ref, bq_ref, bk_ref, bv_ref,
                     fcw_ref, fcb_ref,
                     ln1w_ref, ln1b_ref, ln2w_ref, ln2b_ref,
                     ff1w_ref, ff1b_ref, ff2w_ref, ff2b_ref,
                     sel_ref, mask_ref, avg_ref, outw_ref,
                     o_ref, h_ref, *, num_heads, compute_dtype):
    # One grid step = (branch, layer).  The activation slab h lives in VMEM scratch
    # across the layer axis; per-layer weights are streamed by BlockSpec.
    layer = pl.program_id(1)
    num_layers = pl.num_programs(1)
    H = num_heads
    NT, E = h_ref.shape
    d = E // H

    def dot(spec, a, b):
        return jnp.einsum(spec, a.astype(compute_dtype), b.astype(compute_dtype),
                          preferred_element_type=jnp.float32)

    # ---- input projection: only at layer 0 of each branch ----
    @pl.when(layer == 0)
    def _():
        h_ref[...] = dot('mt,te->me', x_ref[0], pw_ref[0]) + pb_ref[0, 0]

    h = h_ref[...]

    # ---- multi-head self-attention, batched over heads, batch folded into rows ----
    # w{q,k,v} are (E, E) with ROWS in (head, d') order (host-transposed); 1/sqrt(d)
    # is folded into wq/bq on the host.  One plain matmul each, then a free leading
    # reshape gives per-head (d, N*T) operands — no lane slicing anywhere.
    qT = (dot('fe,me->fm', wq_ref[0, 0], h) + bq_ref[0, 0]).reshape(H, d, NT)
    kT = (dot('fe,me->fm', wk_ref[0, 0], h) + bk_ref[0, 0]).reshape(H, d, NT)
    vT = (dot('fe,me->fm', wv_ref[0, 0], h) + bv_ref[0, 0]).reshape(H, d, NT)
    q = jnp.swapaxes(qT, 1, 2)                                     # (H, NT, d)

    s = dot('hmd,hdn->hmn', q, kT) + mask_ref[...]                 # (H, NT, NT)
    s = s - jnp.max(s, axis=-1, keepdims=True)
    p = jnp.exp(s)
    p = p * pl.reciprocal(jnp.sum(p, axis=-1, keepdims=True), approx=True)

    out = dot('hmn,hdn->hmd', p, vT)                               # (H, NT, d)

    # torch's no-permute (N,H,T,d)->(N,T,E) reshape == a single 0/1 row-gather matmul
    # (sel) that lands rows in destination (lane-block, row) order, after which the
    # fc projection is a head-batched matmul against the per-block fc weight (H,d,E)
    # summed over blocks.  No lane concats / per-head slices.
    z = dot('rq,qd->rd', sel_ref[...], out.reshape(H * NT, d)).reshape(H, NT, d)
    attn = jnp.sum(dot('hmd,hdf->hmf', z, fcw_ref[0, 0]), axis=0) + fcb_ref[0, 0]

    x1 = _layer_norm(h + attn, ln1w_ref[0, 0], ln1b_ref[0, 0])
    f = jnp.maximum(dot('mf,fg->mg', x1, ff1w_ref[0, 0]) + ff1b_ref[0, 0], 0.0)
    f = dot('mg,gf->mf', f, ff2w_ref[0, 0]) + ff2b_ref[0, 0]
    h_new = _layer_norm(x1 + f, ln2w_ref[0, 0], ln2b_ref[0, 0])
    h_ref[...] = h_new

    # ---- branch partial of the output head: only at the last layer ----
    @pl.when(layer == num_layers - 1)
    def _():
        m = dot('nm,me->ne', avg_ref[...], h_new)                  # mean over T (matmul)
        o_ref[0] = dot('ne,ef->nf', m, outw_ref[...])              # (N, Opad) lane-dense


# ------------------------------ model wrapper -------------------------------


def deformer_forward(x, params, num_heads, compute_dtype=jnp.float32):
    N, T, D = x.shape
    E = params["temporal_proj_w"].shape[1]
    O = params["out_w"].shape[1]
    L = len(params["temporal_layers"])
    H = num_heads
    assert D == T, "DEformer requires input_dim == seq_len (x_temporal + x_spatial)"
    assert E % H == 0
    d = E // H
    NT = N * T
    Opad = ((O + 127) // 128) * 128
    cd = compute_dtype
    scale = 1.0 / float(d) ** 0.5

    def stack(fn):
        return jnp.stack([
            jnp.stack([fn(lp) for lp in params["temporal_layers"]], 0),
            jnp.stack([fn(lp) for lp in params["spatial_layers"]], 0)], 0)

    # Per-head Q/K/V weights, transposed so ROWS are (head, d'); scale folded into Q.
    wq = stack(lambda lp: (lp["qkv_w"][:, 0 * E:1 * E] * scale).T).astype(cd)
    wk = stack(lambda lp: lp["qkv_w"][:, 1 * E:2 * E].T).astype(cd)
    wv = stack(lambda lp: lp["qkv_w"][:, 2 * E:3 * E].T).astype(cd)
    bq = stack(lambda lp: (lp["qkv_b"][0, 0 * E:1 * E] * scale)[:, None])
    bk = stack(lambda lp: lp["qkv_b"][0, 1 * E:2 * E][:, None])
    bv = stack(lambda lp: lp["qkv_b"][0, 2 * E:3 * E][:, None])
    fcw = stack(lambda lp: lp["fc_w"].reshape(H, d, E)).astype(cd)     # per dest lane block
    fcb = stack(lambda lp: lp["fc_b"])
    ln1w = stack(lambda lp: lp["ln1_w"]); ln1b = stack(lambda lp: lp["ln1_b"])
    ln2w = stack(lambda lp: lp["ln2_w"]); ln2b = stack(lambda lp: lp["ln2_b"])
    ff1w = stack(lambda lp: lp["ff1_w"]).astype(cd); ff1b = stack(lambda lp: lp["ff1_b"])
    ff2w = stack(lambda lp: lp["ff2_w"]).astype(cd); ff2b = stack(lambda lp: lp["ff2_b"])

    proj_w = jnp.stack([params["temporal_proj_w"], params["spatial_proj_w"]], 0).astype(cd)
    proj_b = jnp.stack([params["temporal_proj_b"], params["spatial_proj_b"]], 0)

    # Host-built constants (toy-scale: O((N*T*H)^2) for sel / (N*T)^2 for mask).
    # sel implements torch's no-permute (N,H,T,d)->(N,T,E) reshape as a row gather.
    sel_np = np.zeros((H * NT, H * NT), np.float32)
    for g in range(H):
        for m in range(NT):
            nn, t = divmod(m, T)
            hs, ts = divmod(t * H + g, T)
            sel_np[g * NT + m, hs * NT + nn * T + ts] = 1.0
    sel = jnp.asarray(sel_np, cd)

    blk = np.repeat(np.arange(N), T)
    mask = jnp.asarray(np.where(blk[:, None] == blk[None, :], 0.0, -1e30), jnp.float32)
    avg = jnp.asarray((np.arange(N)[:, None] == blk[None, :]).astype(np.float32) / T)
    out_w_pad = jnp.zeros((E, Opad), jnp.float32).at[:, :O].set(params["out_w"]).astype(cd)

    # Branch inputs as 2-D slabs: [x, x^T] reshaped host-side (no in-kernel concats).
    xin = jnp.stack([x.reshape(NT, T), jnp.transpose(x, (0, 2, 1)).reshape(NT, T)], 0)

    branch_in = [xin, proj_w, proj_b]
    layer_in = [wq, wk, wv, bq, bk, bv, fcw, fcb,
                ln1w, ln1b, ln2w, ln2b, ff1w, ff1b, ff2w, ff2b]
    const_in = [sel, mask, avg, out_w_pad]
    inputs = branch_in + layer_in + const_in

    def branch_spec(a):
        return pl.BlockSpec((1,) + a.shape[1:],
                            lambda b, l, _n=a.ndim - 1: (b,) + (0,) * _n)

    def layer_spec(a):
        return pl.BlockSpec((1, 1) + a.shape[2:],
                            lambda b, l, _n=a.ndim - 2: (b, l) + (0,) * _n)

    def const_spec(a):
        return pl.BlockSpec(a.shape, lambda b, l, _n=a.ndim: (0,) * _n)

    in_specs = ([branch_spec(a) for a in branch_in]
                + [layer_spec(a) for a in layer_in]
                + [const_spec(a) for a in const_in])

    # Advisory cost estimate so XLA overlaps the prologue/epilogue with the kernel.
    macs = (2 * (NT * T * E + N * NT * E + N * E * Opad)
            + 2 * L * (3 * NT * E * E + 2 * H * NT * NT * d
                       + (H * NT) ** 2 * d + NT * E * E + 8 * NT * E * E))
    bytes_accessed = sum(int(np.prod(a.shape)) * a.dtype.itemsize for a in inputs) \
        + 2 * N * Opad * 4
    cost = pl.CostEstimate(flops=int(2 * macs),
                           transcendentals=int(2 * L * H * NT * NT),
                           bytes_accessed=int(bytes_accessed))

    parts = pl.pallas_call(
        functools.partial(_deformer_kernel, num_heads=H, compute_dtype=cd),
        out_shape=jax.ShapeDtypeStruct((2, N, Opad), jnp.float32),
        grid_spec=pltpu.PrefetchScalarGridSpec(
            num_scalar_prefetch=0,
            grid=(2, L),
            in_specs=in_specs,
            out_specs=pl.BlockSpec((1, N, Opad), lambda b, l: (b, 0, 0)),
            scratch_shapes=[pltpu.VMEM((NT, E), jnp.float32)],
        ),
        compiler_params=pltpu.CompilerParams(
            dimension_semantics=("parallel", "arbitrary"),
            vmem_limit_bytes=32 * 1024 * 1024),
        cost_estimate=cost,
    )(*inputs)

    # Combined mean/out-proj is linear: sum branch partials, add bias, drop lane pad.
    return (parts[0] + parts[1])[:, :O] + params["out_b"]


# --------------------------- pure-JAX reference ------------------------------


def _ref_encoder_layer(x, lp, num_heads):
    N, T, E = x.shape
    d = E // num_heads
    qkv = x @ lp["qkv_w"] + lp["qkv_b"][0]
    qkv = qkv.reshape(N, T, 3, num_heads, d).transpose(2, 0, 3, 1, 4)
    q, k, v = qkv[0], qkv[1], qkv[2]
    aw = jnp.einsum("nhqd,nhkd->nhqk", q, k) / (d ** 0.5)
    aw = jax.nn.softmax(aw, axis=-1)
    out = jnp.einsum("nhqk,nhkd->nhqd", aw, v).reshape(N, T, E)  # torch's mixed reshape
    out = out @ lp["fc_w"] + lp["fc_b"][0]

    def ln(y, w, b):
        mu = y.mean(-1, keepdims=True)
        var = ((y - mu) ** 2).mean(-1, keepdims=True)
        return (y - mu) / jnp.sqrt(var + 1e-5) * w[0] + b[0]

    x1 = ln(x + out, lp["ln1_w"], lp["ln1_b"])
    ff = jnp.maximum(x1 @ lp["ff1_w"] + lp["ff1_b"][0], 0.0)
    ff = ff @ lp["ff2_w"] + lp["ff2_b"][0]
    return ln(x1 + ff, lp["ln2_w"], lp["ln2_b"])


def deformer_ref(x, params, num_heads):
    xt = x @ params["temporal_proj_w"] + params["temporal_proj_b"][0]
    for lp in params["temporal_layers"]:
        xt = _ref_encoder_layer(xt, lp, num_heads)
    xs = jnp.transpose(x, (0, 2, 1)) @ params["spatial_proj_w"] + params["spatial_proj_b"][0]
    for lp in params["spatial_layers"]:
        xs = _ref_encoder_layer(xs, lp, num_heads)
    combined = xt + xs
    return combined.mean(axis=1) @ params["out_w"] + params["out_b"][0]


# ------------------------------ parameter init -------------------------------


def _init_linear(key, fan_in, fan_out):
    kw, kb = jax.random.split(key)
    bound = 1.0 / (fan_in ** 0.5)
    w = jax.random.uniform(kw, (fan_in, fan_out), jnp.float32, -bound, bound)
    b = jax.random.uniform(kb, (1, fan_out), jnp.float32, -bound, bound)
    return w, b


def _init_encoder_layer(key, embed_dim, expansion=4):
    k0, k1, k2, k3, k4, k5 = jax.random.split(key, 6)
    qkv_w, qkv_b = _init_linear(k0, embed_dim, 3 * embed_dim)
    fc_w, fc_b = _init_linear(k1, embed_dim, embed_dim)
    ff1_w, ff1_b = _init_linear(k2, embed_dim, expansion * embed_dim)
    ff2_w, ff2_b = _init_linear(k3, expansion * embed_dim, embed_dim)
    ln1_w = 1.0 + 0.1 * jax.random.normal(k4, (1, embed_dim), jnp.float32)
    ln1_b = 0.1 * jax.random.normal(k4, (1, embed_dim), jnp.float32)
    ln2_w = 1.0 + 0.1 * jax.random.normal(k5, (1, embed_dim), jnp.float32)
    ln2_b = 0.1 * jax.random.normal(k5, (1, embed_dim), jnp.float32)
    return dict(qkv_w=qkv_w, qkv_b=qkv_b, fc_w=fc_w, fc_b=fc_b,
                ln1_w=ln1_w, ln1_b=ln1_b, ln2_w=ln2_w, ln2_b=ln2_b,
                ff1_w=ff1_w, ff1_b=ff1_b, ff2_w=ff2_w, ff2_b=ff2_b)


def init_params(key, input_dim, embed_dim, num_heads, num_layers, output_dim, seq_len):
    keys = jax.random.split(key, 3 + 2 * num_layers)
    tp_w, tp_b = _init_linear(keys[0], input_dim, embed_dim)
    sp_w, sp_b = _init_linear(keys[1], seq_len, embed_dim)
    out_w, out_b = _init_linear(keys[2], embed_dim, output_dim)
    temporal_layers = [_init_encoder_layer(keys[3 + i], embed_dim)
                       for i in range(num_layers)]
    spatial_layers = [_init_encoder_layer(keys[3 + num_layers + i], embed_dim)
                      for i in range(num_layers)]
    return dict(temporal_proj_w=tp_w, temporal_proj_b=tp_b,
                spatial_proj_w=sp_w, spatial_proj_b=sp_b,
                out_w=out_w, out_b=out_b,
                temporal_layers=temporal_layers, spatial_layers=spatial_layers)


# ------------------------------------ main -----------------------------------

if __name__ == "__main__":
    # input_dim must equal seq_len for `x_temporal + x_spatial` (as in the PyTorch model).
    N, seq_len, input_dim = 2, 8, 8
    embed_dim, num_heads, num_layers, output_dim = 32, 4, 2, 4

    key = jax.random.PRNGKey(0)
    key, kx, kp = jax.random.split(key, 3)
    x = jax.random.normal(kx, (N, seq_len, input_dim), jnp.float32)
    params = init_params(kp, input_dim, embed_dim, num_heads, num_layers,
                         output_dim, seq_len)

    fwd = jax.jit(functools.partial(deformer_forward, num_heads=num_heads))
    out = jax.block_until_ready(fwd(x, params))

    ref = jax.block_until_ready(deformer_ref(x, params, num_heads))

    assert out.shape == (N, output_dim), out.shape
    np.testing.assert_allclose(np.asarray(out), np.asarray(ref), atol=2e-3, rtol=2e-3)
    print("KERNEL_OK")
</pallas_src>

<mosaic_0001>
module attributes {stable_mosaic.version = 11 : i64} {
  func.func @_deformer_kernel(%arg0: i32, %arg1: i32, %arg2: memref<1x16x8xf32, #tpu.memory_space<vmem>>, %arg3: memref<1x8x32xf32, #tpu.memory_space<vmem>>, %arg4: memref<1x1x32xf32, #tpu.memory_space<vmem>>, %arg5: memref<1x1x32x32xf32, #tpu.memory_space<vmem>>, %arg6: memref<1x1x32x32xf32, #tpu.memory_space<vmem>>, %arg7: memref<1x1x32x32xf32, #tpu.memory_space<vmem>>, %arg8: memref<1x1x32x1xf32, #tpu.memory_space<vmem>>, %arg9: memref<1x1x32x1xf32, #tpu.memory_space<vmem>>, %arg10: memref<1x1x32x1xf32, #tpu.memory_space<vmem>>, %arg11: memref<1x1x4x8x32xf32, #tpu.memory_space<vmem>>, %arg12: memref<1x1x1x32xf32, #tpu.memory_space<vmem>>, %arg13: memref<1x1x1x32xf32, #tpu.memory_space<vmem>>, %arg14: memref<1x1x1x32xf32, #tpu.memory_space<vmem>>, %arg15: memref<1x1x1x32xf32, #tpu.memory_space<vmem>>, %arg16: memref<1x1x1x32xf32, #tpu.memory_space<vmem>>, %arg17: memref<1x1x32x128xf32, #tpu.memory_space<vmem>>, %arg18: memref<1x1x1x128xf32, #tpu.memory_space<vmem>>, %arg19: memref<1x1x128x32xf32, #tpu.memory_space<vmem>>, %arg20: memref<1x1x1x32xf32, #tpu.memory_space<vmem>>, %arg21: memref<64x64xf32, #tpu.memory_space<vmem>>, %arg22: memref<16x16xf32, #tpu.memory_space<vmem>>, %arg23: memref<2x16xf32, #tpu.memory_space<vmem>>, %arg24: memref<32x128xf32, #tpu.memory_space<vmem>>, %arg25: memref<1x2x128xf32, #tpu.memory_space<vmem>>, %arg26: memref<16x32xf32, #tpu.memory_space<vmem>>) attributes {dimension_semantics = [#tpu.dimension_semantics<parallel>, #tpu.dimension_semantics<arbitrary>], iteration_bounds = array<i64: 2, 2>, scalar_prefetch = 0 : i64, scratch_operands = 1 : i64, tpu.core_type = #tpu.core_type<tc>, window_params = [{transform_indices = @transform_0, window_bounds = array<i64: 1, 16, 8>}, {transform_indices = @transform_1, window_bounds = array<i64: 1, 8, 32>}, {transform_indices = @transform_2, window_bounds = array<i64: 1, 1, 32>}, {transform_indices = @transform_3, window_bounds = array<i64: 1, 1, 32, 32>}, {transform_indices = @transform_4, window_bounds = array<i64: 1, 1, 32, 32>}, {transform_indices = @transform_5, window_bounds = array<i64: 1, 1, 32, 32>}, {transform_indices = @transform_6, window_bounds = array<i64: 1, 1, 32, 1>}, {transform_indices = @transform_7, window_bounds = array<i64: 1, 1, 32, 1>}, {transform_indices = @transform_8, window_bounds = array<i64: 1, 1, 32, 1>}, {transform_indices = @transform_9, window_bounds = array<i64: 1, 1, 4, 8, 32>}, {transform_indices = @transform_10, window_bounds = array<i64: 1, 1, 1, 32>}, {transform_indices = @transform_11, window_bounds = array<i64: 1, 1, 1, 32>}, {transform_indices = @transform_12, window_bounds = array<i64: 1, 1, 1, 32>}, {transform_indices = @transform_13, window_bounds = array<i64: 1, 1, 1, 32>}, {transform_indices = @transform_14, window_bounds = array<i64: 1, 1, 1, 32>}, {transform_indices = @transform_15, window_bounds = array<i64: 1, 1, 32, 128>}, {transform_indices = @transform_16, window_bounds = array<i64: 1, 1, 1, 128>}, {transform_indices = @transform_17, window_bounds = array<i64: 1, 1, 128, 32>}, {transform_indices = @transform_18, window_bounds = array<i64: 1, 1, 1, 32>}, {pipeline_mode = #tpu.pipeline_mode<synchronous>, transform_indices = @transform_19, window_bounds = array<i64: 64, 64>}, {pipeline_mode = #tpu.pipeline_mode<synchronous>, transform_indices = @transform_20, window_bounds = array<i64: 16, 16>}, {pipeline_mode = #tpu.pipeline_mode<synchronous>, transform_indices = @transform_21, window_bounds = array<i64: 2, 16>}, {pipeline_mode = #tpu.pipeline_mode<synchronous>, transform_indices = @transform_22, window_bounds = array<i64: 32, 128>}, {transform_indices = @transform_23, window_bounds = array<i64: 1, 2, 128>}]} {
    %c0_i32 = arith.constant 0 : i32
    %0 = arith.cmpi eq, %arg1, %c0_i32 : i32
    %1 = arith.extui %0 : i1 to i32
    %c0_i32_0 = arith.constant 0 : i32
    %2 = arith.cmpi ne, %1, %c0_i32_0 : i32
    scf.if %2 {
      %c0_96 = arith.constant 0 : index
      %c0_97 = arith.constant 0 : index
      %c0_98 = arith.constant 0 : index
      %131 = vector.load %arg2[%c0_96, %c0_97, %c0_98] : memref<1x16x8xf32, #tpu.memory_space<vmem>>, vector<1x16x8xf32>
      %132 = vector.shape_cast %131 : vector<1x16x8xf32> to vector<16x8xf32>
      %c0_99 = arith.constant 0 : index
      %c0_100 = arith.constant 0 : index
      %c0_101 = arith.constant 0 : index
      %133 = vector.load %arg3[%c0_99, %c0_100, %c0_101] : memref<1x8x32xf32, #tpu.memory_space<vmem>>, vector<1x8x32xf32>
      %134 = vector.shape_cast %133 : vector<1x8x32xf32> to vector<8x32xf32>
      "tpu.trace_start"() <{level = 10 : i32, message = "mt,te->me"}> : () -> ()
      %cst_102 = arith.constant dense<0.000000e+00> : vector<16x32xf32>
      %135 = tpu.matmul %132, %134, %cst_102 {dimension_numbers = #tpu.dot_dimension_numbers<[1], [0], [0], [1], [0, 0, 1, 1], [], []>} : vector<16x8xf32>, vector<8x32xf32>, vector<16x32xf32> -> vector<16x32xf32>
      "tpu.trace_stop"() : () -> ()
      %c0_103 = arith.constant 0 : index
      %c0_104 = arith.constant 0 : index
      %c0_105 = arith.constant 0 : index
      %136 = vector.load %arg4[%c0_103, %c0_104, %c0_105] : memref<1x1x32xf32, #tpu.memory_space<vmem>>, vector<1x1x32xf32>
      %137 = vector.shape_cast %136 : vector<1x1x32xf32> to vector<32xf32>
      %138 = vector.shape_cast %137 : vector<32xf32> to vector<1x32xf32>
      %139 = vector.broadcast %138 : vector<1x32xf32> to vector<16x32xf32>
      %140 = arith.addf %135, %139 : vector<16x32xf32>
      %c0_106 = arith.constant 0 : index
      %c0_107 = arith.constant 0 : index
      %141 = vector.load %arg26[%c0_106, %c0_107] : memref<16x32xf32, #tpu.memory_space<vmem>>, vector<16x32xf32>
      tpu.vector_store %arg26[%c0_106, %c0_107], %140 {strides = array<i32>} : memref<16x32xf32, #tpu.memory_space<vmem>>, vector<16x32xf32>,
    } else {
    }
    %c0 = arith.constant 0 : index
    %c0_1 = arith.constant 0 : index
    %3 = vector.load %arg26[%c0, %c0_1] : memref<16x32xf32, #tpu.memory_space<vmem>>, vector<16x32xf32>
    %c0_2 = arith.constant 0 : index
    %c0_3 = arith.constant 0 : index
    %c0_4 = arith.constant 0 : index
    %c0_5 = arith.constant 0 : index
    %4 = vector.load %arg5[%c0_2, %c0_3, %c0_4, %c0_5] : memref<1x1x32x32xf32, #tpu.memory_space<vmem>>, vector<1x1x32x32xf32>
    %5 = vector.shape_cast %4 : vector<1x1x32x32xf32> to vector<32x32xf32>
    "tpu.trace_start"() <{level = 10 : i32, message = "fe,me->fm"}> : () -> ()
    %cst = arith.constant dense<0.000000e+00> : vector<32x16xf32>
    %6 = tpu.matmul %5, %3, %cst {dimension_numbers = #tpu.dot_dimension_numbers<[1], [1], [0], [0], [0, 0, 1, 0], [], []>} : vector<32x32xf32>, vector<16x32xf32>, vector<32x16xf32> -> vector<32x16xf32>
    "tpu.trace_stop"() : () -> ()
    %c0_6 = arith.constant 0 : index
    %c0_7 = arith.constant 0 : index
    %c0_8 = arith.constant 0 : index
    %c0_9 = arith.constant 0 : index
    %7 = vector.load %arg8[%c0_6, %c0_7, %c0_8, %c0_9] : memref<1x1x32x1xf32, #tpu.memory_space<vmem>>, vector<1x1x32x1xf32>
    %8 = vector.shape_cast %7 : vector<1x1x32x1xf32> to vector<32x1xf32>
    %9 = vector.broadcast %8 : vector<32x1xf32> to vector<32x16xf32>
    %10 = arith.addf %6, %9 : vector<32x16xf32>
    %11 = vector.shape_cast %10 : vector<32x16xf32> to vector<4x8x16xf32>
    %c0_10 = arith.constant 0 : index
    %c0_11 = arith.constant 0 : index
    %c0_12 = arith.constant 0 : index
    %c0_13 = arith.constant 0 : index
    %12 = vector.load %arg6[%c0_10, %c0_11, %c0_12, %c0_13] : memref<1x1x32x32xf32, #tpu.memory_space<vmem>>, vector<1x1x32x32xf32>
    %13 = vector.shape_cast %12 : vector<1x1x32x32xf32> to vector<32x32xf32>
    "tpu.trace_start"() <{level = 10 : i32, message = "fe,me->fm"}> : () -> ()
    %cst_14 = arith.constant dense<0.000000e+00> : vector<32x16xf32>
    %14 = tpu.matmul %13, %3, %cst_14 {dimension_numbers = #tpu.dot_dimension_numbers<[1], [1], [0], [0], [0, 0, 1, 0], [], []>} : vector<32x32xf32>, vector<16x32xf32>, vector<32x16xf32> -> vector<32x16xf32>
    "tpu.trace_stop"() : () -> ()
    %c0_15 = arith.constant 0 : index
    %c0_16 = arith.constant 0 : index
    %c0_17 = arith.constant 0 : index
    %c0_18 = arith.constant 0 : index
    %15 = vector.load %arg9[%c0_15, %c0_16, %c0_17, %c0_18] : memref<1x1x32x1xf32, #tpu.memory_space<vmem>>, vector<1x1x32x1xf32>
    %16 = vector.shape_cast %15 : vector<1x1x32x1xf32> to vector<32x1xf32>
    %17 = vector.broadcast %16 : vector<32x1xf32> to vector<32x16xf32>
    %18 = arith.addf %14, %17 : vector<32x16xf32>
    %19 = vector.shape_cast %18 : vector<32x16xf32> to vector<4x8x16xf32>
    %c0_19 = arith.constant 0 : index
    %c0_20 = arith.constant 0 : index
    %c0_21 = arith.constant 0 : index
    %c0_22 = arith.constant 0 : index
    %20 = vector.load %arg7[%c0_19, %c0_20, %c0_21, %c0_22] : memref<1x1x32x32xf32, #tpu.memory_space<vmem>>, vector<1x1x32x32xf32>
    %21 = vector.shape_cast %20 : vector<1x1x32x32xf32> to vector<32x32xf32>
    "tpu.trace_start"() <{level = 10 : i32, message = "fe,me->fm"}> : () -> ()
    %cst_23 = arith.constant dense<0.000000e+00> : vector<32x16xf32>
    %22 = tpu.matmul %21, %3, %cst_23 {dimension_numbers = #tpu.dot_dimension_numbers<[1], [1], [0], [0], [0, 0, 1, 0], [], []>} : vector<32x32xf32>, vector<16x32xf32>, vector<32x16xf32> -> vector<32x16xf32>
    "tpu.trace_stop"() : () -> ()
    %c0_24 = arith.constant 0 : index
    %c0_25 = arith.constant 0 : index
    %c0_26 = arith.constant 0 : index
    %c0_27 = arith.constant 0 : index
    %23 = vector.load %arg10[%c0_24, %c0_25, %c0_26, %c0_27] : memref<1x1x32x1xf32, #tpu.memory_space<vmem>>, vector<1x1x32x1xf32>
    %24 = vector.shape_cast %23 : vector<1x1x32x1xf32> to vector<32x1xf32>
    %25 = vector.broadcast %24 : vector<32x1xf32> to vector<32x16xf32>
    %26 = arith.addf %22, %25 : vector<32x16xf32>
    %27 = vector.shape_cast %26 : vector<32x16xf32> to vector<4x8x16xf32>
    %28 = tpu.transpose %11, [0, 2, 1] : vector<4x8x16xf32> -> vector<4x16x8xf32>
    "tpu.trace_start"() <{level = 10 : i32, message = "hmd,hdn->hmn"}> : () -> ()
    %cst_28 = arith.constant dense<0.000000e+00> : vector<4x16x16xf32>
    %29 = tpu.matmul %28, %19, %cst_28 {dimension_numbers = #tpu.dot_dimension_numbers<[2], [1], [1], [2], [0, 0, 0, 1, 1, 2], [0], [0]>} : vector<4x16x8xf32>, vector<4x8x16xf32>, vector<4x16x16xf32> -> vector<4x16x16xf32>
    "tpu.trace_stop"() : () -> ()
    %c0_29 = arith.constant 0 : index
    %c0_30 = arith.constant 0 : index
    %30 = vector.load %arg22[%c0_29, %c0_30] : memref<16x16xf32, #tpu.memory_space<vmem>>, vector<16x16xf32>
    %31 = vector.shape_cast %30 : vector<16x16xf32> to vector<1x16x16xf32>
    %32 = vector.broadcast %31 : vector<1x16x16xf32> to vector<4x16x16xf32>
    %33 = arith.addf %29, %32 : vector<4x16x16xf32>
    %cst_31 = arith.constant dense<0xFF800000> : vector<4x16xf32>
    %34 = vector.multi_reduction <maximumf>, %33, %cst_31 [2] : vector<4x16x16xf32> to vector<4x16xf32>
    %35 = vector.shape_cast %34 : vector<4x16xf32> to vector<4x16x1xf32>
    %36 = vector.broadcast %35 : vector<4x16x1xf32> to vector<4x16x16xf32>
    %37 = arith.subf %33, %36 : vector<4x16x16xf32>
    %38 = math.exp %37 : vector<4x16x16xf32>
    %cst_32 = arith.constant dense<0.000000e+00> : vector<4x16xf32>
    %39 = vector.multi_reduction <add>, %38, %cst_32 [2] : vector<4x16x16xf32> to vector<4x16xf32>
    %40 = vector.shape_cast %39 : vector<4x16xf32> to vector<4x16x1xf32>
    %41 = tpu.reciprocal %40 {approx = true} : vector<4x16x1xf32> -> vector<4x16x1xf32>
    %42 = vector.broadcast %41 : vector<4x16x1xf32> to vector<4x16x16xf32>
    %43 = arith.mulf %38, %42 : vector<4x16x16xf32>
    "tpu.trace_start"() <{level = 10 : i32, message = "hmn,hdn->hmd"}> : () -> ()
    %cst_33 = arith.constant dense<0.000000e+00> : vector<4x16x8xf32>
    %44 = tpu.matmul %43, %27, %cst_33 {dimension_numbers = #tpu.dot_dimension_numbers<[2], [2], [1], [1], [0, 0, 0, 1, 1, 1], [0], [0]>} : vector<4x16x16xf32>, vector<4x8x16xf32>, vector<4x16x8xf32> -> vector<4x16x8xf32>
    "tpu.trace_stop"() : () -> ()
    %c0_34 = arith.constant 0 : index
    %c0_35 = arith.constant 0 : index
    %45 = vector.load %arg21[%c0_34, %c0_35] : memref<64x64xf32, #tpu.memory_space<vmem>>, vector<64x64xf32>
    %46 = vector.shape_cast %44 : vector<4x16x8xf32> to vector<64x8xf32>
    "tpu.trace_start"() <{level = 10 : i32, message = "rq,qd->rd"}> : () -> ()
    %cst_36 = arith.constant dense<0.000000e+00> : vector<64x8xf32>
    %47 = tpu.matmul %45, %46, %cst_36 {dimension_numbers = #tpu.dot_dimension_numbers<[1], [0], [0], [1], [0, 0, 1, 1], [], []>} : vector<64x64xf32>, vector<64x8xf32>, vector<64x8xf32> -> vector<64x8xf32>
    "tpu.trace_stop"() : () -> ()
    %48 = vector.shape_cast %47 : vector<64x8xf32> to vector<4x16x8xf32>
    %c0_37 = arith.constant 0 : index
    %c0_38 = arith.constant 0 : index
    %c0_39 = arith.constant 0 : index
    %c0_40 = arith.constant 0 : index
    %c0_41 = arith.constant 0 : index
    %49 = vector.load %arg11[%c0_37, %c0_38, %c0_39, %c0_40, %c0_41] : memref<1x1x4x8x32xf32, #tpu.memory_space<vmem>>, vector<1x1x4x8x32xf32>
    %50 = vector.shape_cast %49 : vector<1x1x4x8x32xf32> to vector<4x8x32xf32>
    "tpu.trace_start"() <{level = 10 : i32, message = "hmd,hdf->hmf"}> : () -> ()
    %cst_42 = arith.constant dense<0.000000e+00> : vector<4x16x32xf32>
    %51 = tpu.matmul %48, %50, %cst_42 {dimension_numbers = #tpu.dot_dimension_numbers<[2], [1], [1], [2], [0, 0, 0, 1, 1, 2], [0], [0]>} : vector<4x16x8xf32>, vector<4x8x32xf32>, vector<4x16x32xf32> -> vector<4x16x32xf32>
    "tpu.trace_stop"() : () -> ()
    %cst_43 = arith.constant dense<0.000000e+00> : vector<16x32xf32>
    %52 = vector.multi_reduction <add>, %51, %cst_43 [0] : vector<4x16x32xf32> to vector<16x32xf32>
    %c0_44 = arith.constant 0 : index
    %c0_45 = arith.constant 0 : index
    %c0_46 = arith.constant 0 : index
    %c0_47 = arith.constant 0 : index
    %53 = vector.load %arg12[%c0_44, %c0_45, %c0_46, %c0_47] : memref<1x1x1x32xf32, #tpu.memory_space<vmem>>, vector<1x1x1x32xf32>
    %54 = vector.shape_cast %53 : vector<1x1x1x32xf32> to vector<1x32xf32>
    %55 = vector.broadcast %54 : vector<1x32xf32> to vector<16x32xf32>
    %56 = arith.addf %52, %55 : vector<16x32xf32>
    %57 = arith.addf %3, %56 : vector<16x32xf32>
    %c0_48 = arith.constant 0 : index
    %c0_49 = arith.constant 0 : index
    %c0_50 = arith.constant 0 : index
    %c0_51 = arith.constant 0 : index
    %58 = vector.load %arg13[%c0_48, %c0_49, %c0_50, %c0_51] : memref<1x1x1x32xf32, #tpu.memory_space<vmem>>, vector<1x1x1x32xf32>
    %59 = vector.shape_cast %58 : vector<1x1x1x32xf32> to vector<1x32xf32>
    %c0_52 = arith.constant 0 : index
    %c0_53 = arith.constant 0 : index
    %c0_54 = arith.constant 0 : index
    %c0_55 = arith.constant 0 : index
    %60 = vector.load %arg14[%c0_52, %c0_53, %c0_54, %c0_55] : memref<1x1x1x32xf32, #tpu.memory_space<vmem>>, vector<1x1x1x32xf32>
    %61 = vector.shape_cast %60 : vector<1x1x1x32xf32> to vector<1x32xf32>
    %cst_56 = arith.constant dense<0.000000e+00> : vector<16xf32>
    %62 = vector.multi_reduction <add>, %57, %cst_56 [1] : vector<16x32xf32> to vector<16xf32>
    %63 = vector.shape_cast %62 : vector<16xf32> to vector<16x1xf32>
    %cst_57 = arith.constant 3.200000e+01 : f32
    %64 = vector.broadcast %cst_57 : f32 to vector<16x1xf32>
    %65 = arith.divf %63, %64 : vector<16x1xf32>
    %66 = vector.broadcast %65 : vector<16x1xf32> to vector<16x32xf32>
    %67 = arith.subf %57, %66 : vector<16x32xf32>
    %68 = arith.mulf %67, %67 : vector<16x32xf32>
    %cst_58 = arith.constant dense<0.000000e+00> : vector<16xf32>
    %69 = vector.multi_reduction <add>, %68, %cst_58 [1] : vector<16x32xf32> to vector<16xf32>
    %70 = vector.shape_cast %69 : vector<16xf32> to vector<16x1xf32>
    %cst_59 = arith.constant 3.200000e+01 : f32
    %71 = vector.broadcast %cst_59 : f32 to vector<16x1xf32>
    %72 = arith.divf %70, %71 : vector<16x1xf32>
    %73 = vector.broadcast %65 : vector<16x1xf32> to vector<16x32xf32>
    %74 = arith.subf %57, %73 : vector<16x32xf32>
    %cst_60 = arith.constant 9.99999974E-6 : f32
    %75 = vector.broadcast %cst_60 : f32 to vector<16x1xf32>
    %76 = arith.addf %72, %75 : vector<16x1xf32>
    %77 = math.rsqrt %76 : vector<16x1xf32>
    %78 = vector.broadcast %77 : vector<16x1xf32> to vector<16x32xf32>
    %79 = arith.mulf %74, %78 : vector<16x32xf32>
    %80 = vector.broadcast %59 : vector<1x32xf32> to vector<16x32xf32>
    %81 = arith.mulf %79, %80 : vector<16x32xf32>
    %82 = vector.broadcast %61 : vector<1x32xf32> to vector<16x32xf32>
    %83 = arith.addf %81, %82 : vector<16x32xf32>
    %c0_61 = arith.constant 0 : index
    %c0_62 = arith.constant 0 : index
    %c0_63 = arith.constant 0 : index
    %c0_64 = arith.constant 0 : index
    %84 = vector.load %arg17[%c0_61, %c0_62, %c0_63, %c0_64] : memref<1x1x32x128xf32, #tpu.memory_space<vmem>>, vector<1x1x32x128xf32>
    %85 = vector.shape_cast %84 : vector<1x1x32x128xf32> to vector<32x128xf32>
    "tpu.trace_start"() <{level = 10 : i32, message = "mf,fg->mg"}> : () -> ()
    %cst_65 = arith.constant dense<0.000000e+00> : vector<16x128xf32>
    %86 = tpu.matmul %83, %85, %cst_65 {dimension_numbers = #tpu.dot_dimension_numbers<[1], [0], [0], [1], [0, 0, 1, 1], [], []>} : vector<16x32xf32>, vector<32x128xf32>, vector<16x128xf32> -> vector<16x128xf32>
    "tpu.trace_stop"() : () -> ()
    %c0_66 = arith.constant 0 : index
    %c0_67 = arith.constant 0 : index
    %c0_68 = arith.constant 0 : index
    %c0_69 = arith.constant 0 : index
    %87 = vector.load %arg18[%c0_66, %c0_67, %c0_68, %c0_69] : memref<1x1x1x128xf32, #tpu.memory_space<vmem>>, vector<1x1x1x128xf32>
    %88 = vector.shape_cast %87 : vector<1x1x1x128xf32> to vector<1x128xf32>
    %89 = vector.broadcast %88 : vector<1x128xf32> to vector<16x128xf32>
    %90 = arith.addf %86, %89 : vector<16x128xf32>
    %cst_70 = arith.constant 0.000000e+00 : f32
    %91 = vector.broadcast %cst_70 : f32 to vector<16x128xf32>
    %92 = arith.maximumf %90, %91 : vector<16x128xf32>
    %c0_71 = arith.constant 0 : index
    %c0_72 = arith.constant 0 : index
    %c0_73 = arith.constant 0 : index
    %c0_74 = arith.constant 0 : index
    %93 = vector.load %arg19[%c0_71, %c0_72, %c0_73, %c0_74] : memref<1x1x128x32xf32, #tpu.memory_space<vmem>>, vector<1x1x128x32xf32>
    %94 = vector.shape_cast %93 : vector<1x1x128x32xf32> to vector<128x32xf32>
    "tpu.trace_start"() <{level = 10 : i32, message = "mg,gf->mf"}> : () -> ()
    %cst_75 = arith.constant dense<0.000000e+00> : vector<16x32xf32>
    %95 = tpu.matmul %92, %94, %cst_75 {dimension_numbers = #tpu.dot_dimension_numbers<[1], [0], [0], [1], [0, 0, 1, 1], [], []>} : vector<16x128xf32>, vector<128x32xf32>, vector<16x32xf32> -> vector<16x32xf32>
    "tpu.trace_stop"() : () -> ()
    %c0_76 = arith.constant 0 : index
    %c0_77 = arith.constant 0 : index
    %c0_78 = arith.constant 0 : index
    %c0_79 = arith.constant 0 : index
    %96 = vector.load %arg20[%c0_76, %c0_77, %c0_78, %c0_79] : memref<1x1x1x32xf32, #tpu.memory_space<vmem>>, vector<1x1x1x32xf32>
    %97 = vector.shape_cast %96 : vector<1x1x1x32xf32> to vector<1x32xf32>
    %98 = vector.broadcast %97 : vector<1x32xf32> to vector<16x32xf32>
    %99 = arith.addf %95, %98 : vector<16x32xf32>
    %100 = arith.addf %83, %99 : vector<16x32xf32>
    %c0_80 = arith.constant 0 : index
    %c0_81 = arith.constant 0 : index
    %c0_82 = arith.constant 0 : index
    %c0_83 = arith.constant 0 : index
    %101 = vector.load %arg15[%c0_80, %c0_81, %c0_82, %c0_83] : memref<1x1x1x32xf32, #tpu.memory_space<vmem>>, vector<1x1x1x32xf32>
    %102 = vector.shape_cast %101 : vector<1x1x1x32xf32> to vector<1x32xf32>
    %c0_84 = arith.constant 0 : index
    %c0_85 = arith.constant 0 : index
    %c0_86 = arith.constant 0 : index
    %c0_87 = arith.constant 0 : index
    %103 = vector.load %arg16[%c0_84, %c0_85, %c0_86, %c0_87] : memref<1x1x1x32xf32, #tpu.memory_space<vmem>>, vector<1x1x1x32xf32>
    %104 = vector.shape_cast %103 : vector<1x1x1x32xf32> to vector<1x32xf32>
    %cst_88 = arith.constant dense<0.000000e+00> : vector<16xf32>
    %105 = vector.multi_reduction <add>, %100, %cst_88 [1] : vector<16x32xf32> to vector<16xf32>
    %106 = vector.shape_cast %105 : vector<16xf32> to vector<16x1xf32>
    %cst_89 = arith.constant 3.200000e+01 : f32
    %107 = vector.broadcast %cst_89 : f32 to vector<16x1xf32>
    %108 = arith.divf %106, %107 : vector<16x1xf32>
    %109 = vector.broadcast %108 : vector<16x1xf32> to vector<16x32xf32>
    %110 = arith.subf %100, %109 : vector<16x32xf32>
    %111 = arith.mulf %110, %110 : vector<16x32xf32>
    %cst_90 = arith.constant dense<0.000000e+00> : vector<16xf32>
    %112 = vector.multi_reduction <add>, %111, %cst_90 [1] : vector<16x32xf32> to vector<16xf32>
    %113 = vector.shape_cast %112 : vector<16xf32> to vector<16x1xf32>
    %cst_91 = arith.constant 3.200000e+01 : f32
    %114 = vector.broadcast %cst_91 : f32 to vector<16x1xf32>
    %115 = arith.divf %113, %114 : vector<16x1xf32>
    %116 = vector.broadcast %108 : vector<16x1xf32> to vector<16x32xf32>
    %117 = arith.subf %100, %116 : vector<16x32xf32>
    %cst_92 = arith.constant 9.99999974E-6 : f32
    %118 = vector.broadcast %cst_92 : f32 to vector<16x1xf32>
    %119 = arith.addf %115, %118 : vector<16x1xf32>
    %120 = math.rsqrt %119 : vector<16x1xf32>
    %121 = vector.broadcast %120 : vector<16x1xf32> to vector<16x32xf32>
    %122 = arith.mulf %117, %121 : vector<16x32xf32>
    %123 = vector.broadcast %102 : vector<1x32xf32> to vector<16x32xf32>
    %124 = arith.mulf %122, %123 : vector<16x32xf32>
    %125 = vector.broadcast %104 : vector<1x32xf32> to vector<16x32xf32>
    %126 = arith.addf %124, %125 : vector<16x32xf32>
    %c0_93 = arith.constant 0 : index
    %c0_94 = arith.constant 0 : index
    %127 = vector.load %arg26[%c0_93, %c0_94] : memref<16x32xf32, #tpu.memory_space<vmem>>, vector<16x32xf32>
    tpu.vector_store %arg26[%c0_93, %c0_94], %126 {strides = array<i32>} : memref<16x32xf32, #tpu.memory_space<vmem>>, vector<16x32xf32>,
    %c1_i32 = arith.constant 1 : i32
    %128 = arith.cmpi eq, %arg1, %c1_i32 : i32
    %129 = arith.extui %128 : i1 to i32
    %c0_i32_95 = arith.constant 0 : i32
    %130 = arith.cmpi ne, %129, %c0_i32_95 : i32
    scf.if %130 {
      %c0_96 = arith.constant 0 : index
      %c0_97 = arith.constant 0 : index
      %131 = vector.load %arg23[%c0_96, %c0_97] : memref<2x16xf32, #tpu.memory_space<vmem>>, vector<2x16xf32>
      "tpu.trace_start"() <{level = 10 : i32, message = "nm,me->ne"}> : () -> ()
      %cst_98 = arith.constant dense<0.000000e+00> : vector<2x32xf32>
      %132 = tpu.matmul %131, %126, %cst_98 {dimension_numbers = #tpu.dot_dimension_numbers<[1], [0], [0], [1], [0, 0, 1, 1], [], []>} : vector<2x16xf32>, vector<16x32xf32>, vector<2x32xf32> -> vector<2x32xf32>
      "tpu.trace_stop"() : () -> ()
      %c0_99 = arith.constant 0 : index
      %c0_100 = arith.constant 0 : index
      %133 = vector.load %arg24[%c0_99, %c0_100] : memref<32x128xf32, #tpu.memory_space<vmem>>, vector<32x128xf32>
      "tpu.trace_start"() <{level = 10 : i32, message = "ne,ef->nf"}> : () -> ()
      %cst_101 = arith.constant dense<0.000000e+00> : vector<2x128xf32>
      %134 = tpu.matmul %132, %133, %cst_101 {dimension_numbers = #tpu.dot_dimension_numbers<[1], [0], [0], [1], [0, 0, 1, 1], [], []>} : vector<2x32xf32>, vector<32x128xf32>, vector<2x128xf32> -> vector<2x128xf32>
      "tpu.trace_stop"() : () -> ()
      %c0_102 = arith.constant 0 : index
      %c0_103 = arith.constant 0 : index
      %c0_104 = arith.constant 0 : index
      %135 = vector.load %arg25[%c0_102, %c0_103, %c0_104] : memref<1x2x128xf32, #tpu.memory_space<vmem>>, vector<1x2x128xf32>
      %136 = vector.shape_cast %135 : vector<1x2x128xf32> to vector<2x128xf32>
      %137 = vector.shape_cast %134 : vector<2x128xf32> to vector<1x2x128xf32>
      tpu.vector_store %arg25[%c0_102, %c0_103, %c0_104], %137 {strides = array<i32>} : memref<1x2x128xf32, #tpu.memory_space<vmem>>, vector<1x2x128xf32>,
    } else {
    }
    return
  }
  func.func @transform_0(%arg0: i32, %arg1: i32) -> (i32, i32, i32) {
    %c0_i32 = arith.constant 0 : i32
    %c0_i32_0 = arith.constant 0 : i32
    %c0_i32_1 = arith.constant 0 : i32
    return %arg0, %c0_i32, %c0_i32_0 : i32, i32, i32
  }
  func.func @transform_1(%arg0: i32, %arg1: i32) -> (i32, i32, i32) {
    %c0_i32 = arith.constant 0 : i32
    %c0_i32_0 = arith.constant 0 : i32
    %c0_i32_1 = arith.constant 0 : i32
    return %arg0, %c0_i32, %c0_i32_0 : i32, i32, i32
  }
  func.func @transform_2(%arg0: i32, %arg1: i32) -> (i32, i32, i32) {
    %c0_i32 = arith.constant 0 : i32
    %c0_i32_0 = arith.constant 0 : i32
    %c0_i32_1 = arith.constant 0 : i32
    return %arg0, %c0_i32, %c0_i32_0 : i32, i32, i32
  }
  func.func @transform_3(%arg0: i32, %arg1: i32) -> (i32, i32, i32, i32) {
    %c0_i32 = arith.constant 0 : i32
    %c0_i32_0 = arith.constant 0 : i32
    %c0_i32_1 = arith.constant 0 : i32
    return %arg0, %arg1, %c0_i32, %c0_i32_0 : i32, i32, i32, i32
  }
  func.func @transform_4(%arg0: i32, %arg1: i32) -> (i32, i32, i32, i32) {
    %c0_i32 = arith.constant 0 : i32
    %c0_i32_0 = arith.constant 0 : i32
    %c0_i32_1 = arith.constant 0 : i32
    return %arg0, %arg1, %c0_i32, %c0_i32_0 : i32, i32, i32, i32
  }
  func.func @transform_5(%arg0: i32, %arg1: i32) -> (i32, i32, i32, i32) {
    %c0_i32 = arith.constant 0 : i32
    %c0_i32_0 = arith.constant 0 : i32
    %c0_i32_1 = arith.constant 0 : i32
    return %arg0, %arg1, %c0_i32, %c0_i32_0 : i32, i32, i32, i32
  }
  func.func @transform_6(%arg0: i32, %arg1: i32) -> (i32, i32, i32, i32) {
    %c0_i32 = arith.constant 0 : i32
    %c0_i32_0 = arith.constant 0 : i32
    %c0_i32_1 = arith.constant 0 : i32
    return %arg0, %arg1, %c0_i32, %c0_i32_0 : i32, i32, i32, i32
  }
  func.func @transform_7(%arg0: i32, %arg1: i32) -> (i32, i32, i32, i32) {
    %c0_i32 = arith.constant 0 : i32
    %c0_i32_0 = arith.constant 0 : i32
    %c0_i32_1 = arith.constant 0 : i32
    return %arg0, %arg1, %c0_i32, %c0_i32_0 : i32, i32, i32, i32
  }
  func.func @transform_8(%arg0: i32, %arg1: i32) -> (i32, i32, i32, i32) {
    %c0_i32 = arith.constant 0 : i32
    %c0_i32_0 = arith.constant 0 : i32
    %c0_i32_1 = arith.constant 0 : i32
    return %arg0, %arg1, %c0_i32, %c0_i32_0 : i32, i32, i32, i32
  }
  func.func @transform_9(%arg0: i32, %arg1: i32) -> (i32, i32, i32, i32, i32) {
    %c0_i32 = arith.constant 0 : i32
    %c0_i32_0 = arith.constant 0 : i32
    %c0_i32_1 = arith.constant 0 : i32
    %c0_i32_2 = arith.constant 0 : i32
    return %arg0, %arg1, %c0_i32, %c0_i32_0, %c0_i32_1 : i32, i32, i32, i32, i32
  }
  func.func @transform_10(%arg0: i32, %arg1: i32) -> (i32, i32, i32, i32) {
    %c0_i32 = arith.constant 0 : i32
    %c0_i32_0 = arith.constant 0 : i32
    %c0_i32_1 = arith.constant 0 : i32
    return %arg0, %arg1, %c0_i32, %c0_i32_0 : i32, i32, i32, i32
  }
  func.func @transform_11(%arg0: i32, %arg1: i32) -> (i32, i32, i32, i32) {
    %c0_i32 = arith.constant 0 : i32
    %c0_i32_0 = arith.constant 0 : i32
    %c0_i32_1 = arith.constant 0 : i32
    return %arg0, %arg1, %c0_i32, %c0_i32_0 : i32, i32, i32, i32
  }
  func.func @transform_12(%arg0: i32, %arg1: i32) -> (i32, i32, i32, i32) {
    %c0_i32 = arith.constant 0 : i32
    %c0_i32_0 = arith.constant 0 : i32
    %c0_i32_1 = arith.constant 0 : i32
    return %arg0, %arg1, %c0_i32, %c0_i32_0 : i32, i32, i32, i32
  }
  func.func @transform_13(%arg0: i32, %arg1: i32) -> (i32, i32, i32, i32) {
    %c0_i32 = arith.constant 0 : i32
    %c0_i32_0 = arith.constant 0 : i32
    %c0_i32_1 = arith.constant 0 : i32
    return %arg0, %arg1, %c0_i32, %c0_i32_0 : i32, i32, i32, i32
  }
  func.func @transform_14(%arg0: i32, %arg1: i32) -> (i32, i32, i32, i32) {
    %c0_i32 = arith.constant 0 : i32
    %c0_i32_0 = arith.constant 0 : i32
    %c0_i32_1 = arith.constant 0 : i32
    return %arg0, %arg1, %c0_i32, %c0_i32_0 : i32, i32, i32, i32
  }
  func.func @transform_15(%arg0: i32, %arg1: i32) -> (i32, i32, i32, i32) {
    %c0_i32 = arith.constant 0 : i32
    %c0_i32_0 = arith.constant 0 : i32
    %c0_i32_1 = arith.constant 0 : i32
    return %arg0, %arg1, %c0_i32, %c0_i32_0 : i32, i32, i32, i32
  }
  func.func @transform_16(%arg0: i32, %arg1: i32) -> (i32, i32, i32, i32) {
    %c0_i32 = arith.constant 0 : i32
    %c0_i32_0 = arith.constant 0 : i32
    %c0_i32_1 = arith.constant 0 : i32
    return %arg0, %arg1, %c0_i32, %c0_i32_0 : i32, i32, i32, i32
  }
  func.func @transform_17(%arg0: i32, %arg1: i32) -> (i32, i32, i32, i32) {
    %c0_i32 = arith.constant 0 : i32
    %c0_i32_0 = arith.constant 0 : i32
    %c0_i32_1 = arith.constant 0 : i32
    return %arg0, %arg1, %c0_i32, %c0_i32_0 : i32, i32, i32, i32
  }
  func.func @transform_18(%arg0: i32, %arg1: i32) -> (i32, i32, i32, i32) {
    %c0_i32 = arith.constant 0 : i32
    %c0_i32_0 = arith.constant 0 : i32
    %c0_i32_1 = arith.constant 0 : i32
    return %arg0, %arg1, %c0_i32, %c0_i32_0 : i32, i32, i32, i32
  }
  func.func @transform_19(%arg0: i32, %arg1: i32) -> (i32, i32) {
    %c0_i32 = arith.constant 0 : i32
    %c0_i32_0 = arith.constant 0 : i32
    %c0_i32_1 = arith.constant 0 : i32
    return %c0_i32, %c0_i32_0 : i32, i32
  }
  func.func @transform_20(%arg0: i32, %arg1: i32) -> (i32, i32) {
    %c0_i32 = arith.constant 0 : i32
    %c0_i32_0 = arith.constant 0 : i32
    %c0_i32_1 = arith.constant 0 : i32
    return %c0_i32, %c0_i32_0 : i32, i32
  }
  func.func @transform_21(%arg0: i32, %arg1: i32) -> (i32, i32) {
    %c0_i32 = arith.constant 0 : i32
    %c0_i32_0 = arith.constant 0 : i32
    %c0_i32_1 = arith.constant 0 : i32
    return %c0_i32, %c0_i32_0 : i32, i32
  }
  func.func @transform_22(%arg0: i32, %arg1: i32) -> (i32, i32) {
    %c0_i32 = arith.constant 0 : i32
    %c0_i32_0 = arith.constant 0 : i32
    %c0_i32_1 = arith.constant 0 : i32
    return %c0_i32, %c0_i32_0 : i32, i32
  }
  func.func @transform_23(%arg0: i32, %arg1: i32) -> (i32, i32, i32) {
    %c0_i32 = arith.constant 0 : i32
    %c0_i32_0 = arith.constant 0 : i32
    %c0_i32_1 = arith.constant 0 : i32
    return %arg0, %c0_i32, %c0_i32_0 : i32, i32, i32
  }
}

</mosaic_0001>

<bundles_post_ra>
// kernel: deformer_forward.1
= control target key start
LH: loop header
LB: loop body
LE: loop exit
PB: predicated region body
PF: predicated region fallthrough
CT: control target
= control target key end

     0   :  { %s4591_s30 = smov 0   ;;  %s4593_s24 = smov 0   ;;  %s5025_s0 = inlined_call_operand.vmem [shape: f32[2,16,8], index: 0, kind: input, shape index: {}]   ;;  %s5026_s1 = inlined_call_operand.vmem [shape: f32[2,8,32], index: 1, kind: input, shape index: {}]   ;;  %s5027_s2 = inlined_call_operand.vmem [shape: f32[2,1,32], index: 2, kind: input, shape index: {}]   ;;  %s5028_s3 = inlined_call_operand.vmem [shape: f32[2,2,32,32], index: 3, kind: input, shape index: {}]   ;;  %s5029_s4 = inlined_call_operand.vmem [shape: f32[2,2,32,32], index: 4, kind: input, shape index: {}]   ;;  %s5030_s5 = inlined_call_operand.vmem [shape: f32[2,2,32,32], index: 5, kind: input, shape index: {}]   ;;  %s5031_s6 = inlined_call_operand.vmem [shape: f32[2,2,32,1], index: 6, kind: input, shape index: {}]   ;;  %s5032_s7 = inlined_call_operand.vmem [shape: f32[2,2,32,1], index: 7, kind: input, shape index: {}]   ;;  %s5033_s8 = inlined_call_operand.vmem [shape: f32[2,2,32,1], index: 8, kind: input, shape index: {}]   ;;  %s5034_s9 = inlined_call_operand.vmem [shape: f32[2,2,4,8,32], index: 9, kind: input, shape index: {}]   ;;  %s5035_s10 = inlined_call_operand.vmem [shape: f32[2,2,1,32], index: 10, kind: input, shape index: {}]   ;;  %s5036_s11 = inlined_call_operand.vmem [shape: f32[2,2,1,32], index: 11, kind: input, shape index: {}]   ;;  %s5037_s12 = inlined_call_operand.vmem [shape: f32[2,2,1,32], index: 12, kind: input, shape index: {}]   ;;  %s5038_s13 = inlined_call_operand.vmem [shape: f32[2,2,1,32], index: 13, kind: input, shape index: {}]   ;;  %s5039_s14 = inlined_call_operand.vmem [shape: f32[2,2,1,32], index: 14, kind: input, shape index: {}]   ;;  %s5040_s15 = inlined_call_operand.vmem [shape: f32[2,2,32,128], index: 15, kind: input, shape index: {}]   ;;  %s5041_s16 = inlined_call_operand.vmem [shape: f32[2,2,1,128], index: 16, kind: input, shape index: {}]   ;;  %s5042_s17 = inlined_call_operand.vmem [shape: f32[2,2,128,32], index: 17, kind: input, shape index: {}]   ;;  %s5043_s18 = inlined_call_operand.vmem [shape: f32[2,2,1,32], index: 18, kind: input, shape index: {}]   ;;  %s5044_s19 = inlined_call_operand.vmem [shape: f32[64,64], index: 19, kind: input, shape index: {}]   ;;  %s5045_s20 = inlined_call_operand.vmem [shape: f32[16,16], index: 20, kind: input, shape index: {}]   ;;  %s5046_s21 = inlined_call_operand.vmem [shape: f32[2,16], index: 21, kind: input, shape index: {}]   ;;  %s5047_s22 = inlined_call_operand.vmem [shape: f32[32,128], index: 22, kind: input, shape index: {}]   ;;  %s5048_s23 = inlined_call_operand.vmem [shape: f32[2,2,128], index: 23, kind: output, shape index: {}]  }
   0x1   :  { %5061 = sst [smem:[#allocation14_spill]] %s5025_s0  ;;  %s4595_s25 = smov 0  }
   0x2   :  { %5062 = sst [smem:[#allocation15_spill]] %s5026_s1 }
   0x3   :  { %5063 = sst [smem:[#allocation16_spill]] %s5027_s2 }
   0x4   :  { %5064 = sst [smem:[#allocation17_spill]] %s5028_s3 }
   0x5   :  { %5065 = sst [smem:[#allocation18_spill]] %s5029_s4  ;;  %s4589_s4 = smov 0  }
   0x6   :  { %5066 = sst [smem:[#allocation19_spill]] %s5030_s5  ;;  %s4597_s5 = smov 0  }
   0x7   :  { %5067 = sst [smem:[#allocation20_spill]] %s5031_s6 }
   0x8   :  { %5068 = sst [smem:[#allocation21_spill]] %s5032_s7 }
   0x9   :  { %5069 = sst [smem:[#allocation22_spill]] %s5033_s8 }
   0xa   :  { %5070 = sst [smem:[#allocation23_spill]] %s5034_s9 }
   0xb   :  { %5071 = sst [smem:[#allocation24_spill]] %s5036_s11 }
   0xc   :  { %5072 = sst [smem:[#allocation25_spill]] %s5037_s12 }
   0xd   :  { %5073 = sst [smem:[#allocation26_spill]] %s5038_s13 }
   0xe   :  { %5074 = sst [smem:[#allocation27_spill]] %s5040_s15 }
   0xf   :  { %5075 = sst [smem:[#allocation28_spill]] %s5041_s16 }
  0x10   :  { %5076 = sst [smem:[#allocation29_spill]] %s5042_s17 }
  0x11   :  { %5077 = sst [smem:[#allocation30_spill]] %s5043_s18 }
  0x12   :  { %5078 = sst [smem:[#allocation31_spill]] %s5044_s19 }
  0x13   :  { %5079 = sst [smem:[#allocation32_spill]] %s5045_s20 }
  0x14   :  { %5080 = sst [smem:[#allocation33_spill]] %s5046_s21 }
  0x15   :  { %5081 = sst [smem:[#allocation34_spill]] %s5047_s22 }
  0x16   :  { %5082 = sst [smem:[#allocation35_spill]] %s5048_s23 }
  0x17 LB: > { %5083 = sst [smem:[#allocation3_spill]] %s4448_s4  ;;  %s42_s1 = sadd.s32 1, %s4456_s24  ;;  %s4464_s5 = sphi %s4597_s5, %s33_s5   ;;  %s4460_s25 = sphi %s4595_s25, %s5139_s25   ;;  %s4456_s24 = sphi %s4593_s24, %s5138_s24   ;;  %s4452_s30 = sphi %s4591_s30, %s5137_s30   ;;  %s4448_s4 = sphi %s4589_s4, %s5136_s4  }
  0x18   : > { %5084 = sst [smem:[#allocation4_spill]] %s4456_s24  ;;  %s45_s26 = sadd.s32 1, %s4460_s25 }
  0x19   : > { %5085 = sst [smem:[#allocation5_spill]] %s4460_s25  ;;  %p43_p0 = scmp.ge.s32.totalorder %s42_s1, 2 }
  0x1a   : > { %5086 = sst [smem:[#allocation6_spill]] %s4464_s5  ;;  %p3932_p1 = scmp.ge.s32.totalorder %s4464_s5, 1 }
  0x1b   : > { %p908_p2 = scmp.lt.s32.totalorder %s4464_s5, 5  ;;  %s5141_s1 = smov (%p43_p0, %s42_s1), 0 }
  0x1c   : > { %5087 = sst [smem:[#allocation7_spill]] %s5141_s1  ;;  %s5143_s26 = smov (!%p43_p0, %s45_s26), %s4460_s25 }
  0x1d   : > { %p909_p3 = pnand %p3932_p1, %p908_p2  ;;  %p47_p4 = scmp.ge.s32.totalorder %s5143_s26, 2 }
  0x1f   : > { %s5145_s26 = smov (%p47_p4, %s5143_s26), 0  ;;  %912 = sbr.rel (%p909_p3) target bundleno = 3177 (0xc69), region = 112 }
  0x20   : > { %5088 = sst [smem:[#allocation8_spill]] %s5145_s26 }
  0x24   : > { %p1108_p5 = scmp.lt.s32.totalorder %s4452_s30, 1  ;;  %p1122_p6 = scmp.lt.s32.totalorder %s4448_s4, 1 }
  0x25   : > { %s5089_s29 = sld [smem:[#allocation14_spill]] }
  0x26   : > { %s5147_s30 = smov (!%p1108_p5, %s4452_s30), 1  ;;  %s5090_s1 = sld [smem:[#allocation15_spill]] }
  0x27   : > { %s1123_s2 = scalar_select %p1122_p6, %s4448_s4, 1 }
  0x28   : > { %s4043_s6 = sshll.u32 %s5147_s30, 4  ;;  %s3935_s27 = sshll.u32 %s5147_s30, 3 }
  0x29   : > { %s3936_s19 = sshll.u32 %s1123_s2, 2  ;;  %s3957_s17 = sshll.u32 %s5147_s30, 1 }
  0x2a   : > { %s1126_s20 = sadd.s32 %s3936_s19, %s3935_s27  ;;  %s4640_s4 = sadd.s32 %s3957_s17, %s1123_s2 }
  0x2b   : > { %s4630_s3 = scalar_lea.vmem %s5089_s29, %s4043_s6  ;;  %s3938_s23 = sshll.u32 %s1126_s20, 3 }
  0x2c   : > { %s1116_s25 = scalar_lea.vmem %s5090_s1, %s3935_s27  ;;  %s5092_s15 = sld [smem:[#allocation17_spill]] }
  0x2d   : > { %s5094_s5 = sld [smem:[#allocation18_spill]]  ;;  %s3966_s11 = sshll.u32 %s1123_s2, 4 }
  0x2e   : > { %s5096_s6 = sld [smem:[#allocation19_spill]]  ;;  %s3967_s0 = sshll.u32 %s5147_s30, 5 }
  0x2f   : > { %s5098_s7 = sld [smem:[#allocation20_spill]] }
  0x30   : > { %s5100_s8 = sld [smem:[#allocation22_spill]] }
  0x31   : > { %s5102_s9 = sld [smem:[#allocation23_spill]] }
  0x32   : > { %s4645_s1 = scalar_lea.vmem %s5092_s15, %s3938_s23  ;;  %s5099_s15 = sld [smem:[#allocation21_spill]] }
  0x33   : > { %5093 = sst [smem:[#allocation9_spill]] %s4645_s1  ;;  %s4650_s19 = scalar_lea.vmem %s5094_s5, %s3938_s23 }
  0x34   : > { %5095 = sst [smem:[#allocation10_spill]] %s4650_s19  ;;  %s4655_s27 = scalar_lea.vmem %s5096_s6, %s3938_s23 }
  0x35   : > { %5097 = sst [smem:[#allocation11_spill]] %s4655_s27  ;;  %s4660_s28 = scalar_lea.vmem %s5098_s7, %s3938_s23 }
  0x36   : > { %s4670_s21 = scalar_lea.vmem %s5100_s8, %s3938_s23  ;;  %s5107_s27 = sld [smem:[#allocation27_spill]] }
  0x37   : > { %5101 = sst [smem:[#allocation12_spill]] %s4670_s21  ;;  %s4675_s26 = scalar_lea.vmem %s5102_s9, %s3938_s23 }
  0x38   : > { %s4665_s22 = scalar_lea.vmem %s5099_s15, %s3938_s23  ;;  %5103 = sst [smem:[#allocation13_spill]] %s4675_s26 }
  0x39   : > { %s5108_s7 = sld [smem:[#allocation28_spill]]  ;;  %s1240_s15 = sadd.s32 %s3967_s0, %s3966_s11 }
  0x3a   : > { %s5109_s1 = sld [smem:[#allocation30_spill]]  ;;  %s3968_s8 = sshll.u32 %s1240_s15, 3 }
  0x3b   : > { %s5110_s5 = sld [smem:[#allocation35_spill]] }
  0x3c   : > { %s4700_s6 = scalar_lea.vmem %s5107_s27, %s3938_s23  ;;  %s5111_s26 = sld [smem:[#allocation29_spill]] }
  0x3d   : > { %s5112_s16 = sld [smem:[#allocation3_spill]] }
  0x3f   : > { %s1233_s29 = scalar_lea.vmem %s5108_s7, %s4640_s4 }
  0x40   : > { %s1249_s24 = scalar_lea.vmem %s5109_s1, %s4640_s4 }
  0x41   : > { %s4714_s20 = scalar_lea.vmem %s5110_s5, %s3957_s17 }
  0x42   : > { %s4719_s27 = scalar_lea.vmem %s5111_s26, %s3968_s8 }
  0x43   : > { %p3971_p7 = scmp.ne.s32.totalorder %s5112_s16, 0 }
  0x44   : > { %s5113_s13 = sld [smem:[#allocation16_spill]] (!%p3971_p7) }
  0x45   : > { %1257 = sbr.rel (%p3971_p7) target bundleno = 275 (0x113), region = 116 }
  0x4a   : > { %v1260_v0 = vld [vmem:[%s1116_s25] sm:$0xff]  ;;  %vm1268_vm0 = vcmask 64512   ;;  %v1259_v2 = vld [vmem:[%s4630_s3 + $0x8] sm:$0xff]  ;;  %s5114_s17 = scalar_lea.vmem %s5113_s13, %s5147_s30  ;;  %vm1350_vm1 = vcmask 261120  }
  0x4b   : > { %v1258_v1 = vld [vmem:[%s4630_s3] sm:$0xff]  ;;  %4149 = vmatprep.subr.mxu0 %v1260_v0 }
  0x4c   : > { %4151 = vmatprep.mubr.msk.f32.mxu0 %vm1268_vm0, %v1258_v1  ;;  %4150 = vmatpush3.msra.mxu0 %v1260_v0  ;;  %v3972_v3 = vld [vmem:[%s5114_s17] ss:$0 sm:$0xff] }
  0x4d   : > { %4152 = vmatmul.mubr.msk.f32.vlgmr.msra.gmra.mxu0 %vm1268_vm0, %v1259_v2 }
 0x10d   : > { %v4153_v4 = vpop.f32.mrf.mxu0 }
 0x10e   : > { %v1347_v5 = vadd.f32 %v4153_v4, %v3972_v3 }
 0x10f   : > { %v1341_v6 = vpop.f32.mrf.mxu0 }
 0x110   : > { %1352 = vst.msk [vmem:[#allocation2 + $0x8] sm:$0xff] %vm1350_vm1, %v1347_v5  ;;  %v1342_v7 = vadd.f32 %v3972_v3, %v1341_v6 }
 0x112   : > { %1351 = vst.msk [vmem:[#allocation2] sm:$0xff] %vm1350_vm1, %v1342_v7 }
 0x113 PF: > { %s5115_s8 = sld [smem:[#allocation9_spill]]  ;;  %vm1383_vm2 = vcmask 261120   ;;  %v4466_v11 = vmov 0   ;;  %v1359_v12 = vld [vmem:[%s4660_s28] sm:$0xff]  ;;  %v1362_v13 = vld [vmem:[%s4660_s28 + $0x18] sm:$0xff]  ;;  %v1360_v14 = vld [vmem:[%s4660_s28 + $0x8] sm:$0xff] }
 0x114   : > { %4384 = vset.pattern.permute.xlu0 %v4466_v11  ;;  %4385 = vset.pattern.permute.xlu1 %v4466_v11  ;;  %s5116_s30 = sld [smem:[#allocation10_spill]]  ;;  %v1361_v16 = vld [vmem:[%s4660_s28 + $0x10] sm:$0xff]  ;;  %v1491_v18 = vld [vmem:[%s4665_s22] sm:$0xff]  ;;  %v1492_v20 = vld [vmem:[%s4665_s22 + $0x8] sm:$0xff]  ;;  %vm1867_vm3 = vcmask 64512   ;;  %vm2192_vm4 = vcmask 130048   ;;  %s5122_s28 = scalar_lea.vmem %s5035_s10, %s4640_s4 }
 0x115   : > { %1365 = vperm.xlu0 %4384, %v1359_v12   ;;  %1380 = vperm.xlu1 %4385, %v1362_v13   ;;  %v1494_v22 = vld [vmem:[%s4665_s22 + $0x18] sm:$0xff]  ;;  %s5117_s25 = sld [smem:[#allocation11_spill]]  ;;  %v1493_v24 = vld [vmem:[%s4665_s22 + $0x10] sm:$0xff]  ;;  %vm2625_vm5 = vcmask 523264  }
 0x116   : > { %s5118_s3 = sld [smem:[#allocation32_spill]] }
 0x117   : > { %v4729_v8 = vld [vmem:[#allocation2 + $0x8] sm:$0xff]  ;;  %s5119_s18 = sld [smem:[#allocation12_spill]] }
 0x118   : > { %4154 = vmatprep.subr.msk.mxu1 %vm1383_vm2, %v4729_v8  ;;  %4174 = vmatprep.subr.msk.mxu0 %vm1383_vm2, %v4729_v8  ;;  %s5120_s7 = sld [smem:[#allocation13_spill]] }
 0x119   : > { %v4731_v9 = vld [vmem:[#allocation2] sm:$0xff]  ;;  %4155 = vmatpush3.xpose.msk.msra.mxu1 %vm1383_vm2, %v4729_v8  ;;  %4175 = vmatpush3.xpose.msk.msra.mxu0 %vm1383_vm2, %v4729_v8  ;;  %v1356_v15 = vld [vmem:[%s5115_s8 + $0x8] sm:$0xff]  ;;  %v1357_v17 = vld [vmem:[%s5115_s8 + $0x10] sm:$0xff]  ;;  %s5121_s1 = sld [smem:[#allocation31_spill]] }
 0x11a   : > { %v1355_v10 = vld [vmem:[%s5115_s8] sm:$0xff]  ;;  %4156 = vmatprep.subr.msk.mxu1 %vm1383_vm2, %v4731_v9  ;;  %4176 = vmatprep.subr.msk.mxu0 %vm1383_vm2, %v4731_v9  ;;  %v1358_v19 = vld [vmem:[%s5115_s8 + $0x18] sm:$0xff]  ;;  %v1488_v23 = vld [vmem:[%s5116_s30 + $0x8] sm:$0xff]  ;;  %s5125_s5 = sld [smem:[#allocation25_spill]] }
 0x11b   : > { %4158 = vmatprep.mubr.msk.f32.mxu1 %vm1383_vm2, %v1355_v10  ;;  %1370 = vperm.xlu0 %4384, %v1360_v14   ;;  %v1487_v21 = vld [vmem:[%s5116_s30] sm:$0xff]  ;;  %v1489_v25 = vld [vmem:[%s5116_s30 + $0x10] sm:$0xff]  ;;  %v1490_v26 = vld [vmem:[%s5116_s30 + $0x18] sm:$0xff]  ;;  %s5129_s13 = sld [smem:[#allocation26_spill]] }
 0x11c   : > { %1375 = vperm.xlu1 %4385, %v1361_v16   ;;  %v1614_v27 = vld [vmem:[%s5117_s25 + $0x10] sm:$0xff]  ;;  %v1615_v28 = vld [vmem:[%s5117_s25 + $0x18] sm:$0xff]  ;;  %v1612_v29 = vld [vmem:[%s5117_s25] sm:$0xff]  ;;  %s5132_s22 = sld [smem:[#allocation3_spill]] }
 0x11d   : > { %4157 = vmatpush3.xpose.msk.msra.mxu1 %vm1383_vm2, %v4731_v9  ;;  %4177 = vmatpush3.xpose.msk.msra.mxu0 %vm1383_vm2, %v4731_v9  ;;  %v1613_v30 = vld [vmem:[%s5117_s25 + $0x8] sm:$0xff]  ;;  %v1865_v2 = vld [vmem:[%s5118_s3] sm:$0xff]  ;;  %s5131_s25 = scalar_lea.vmem %s5039_s14, %s4640_s4 }
 0x11e   : > { %4164 = vmatprep.subr.msk.mxu1 %vm1383_vm2, %v4729_v8  ;;  %4178 = vmatprep.mubr.msk.f32.mxu0 %vm1383_vm2, %v1612_v29  ;;  %v1866_v5 = vld [vmem:[%s5118_s3 + $0x8] sm:$0xff] }
 0x11f   : > { %1497 = vperm.xlu0 %4384, %v1491_v18  }
 0x120   : > { %4159 = vmatmul.mubr.msk.f32.vlgmr.msra.gmra.mxu1 %vm1383_vm2, %v1356_v15  ;;  %1502 = vperm.xlu1 %4385, %v1492_v20   ;;  %s5126_s9 = scalar_lea.vmem %s5125_s5, %s4640_s4 }
 0x121   : > { %4165 = vmatpush3.xpose.msk.msra.mxu1 %vm1383_vm2, %v4729_v8  ;;  %4161 = vmatprep.mubr.msk.f32.mxu1 %vm1383_vm2, %v1357_v17  ;;  %s5130_s17 = scalar_lea.vmem %s5129_s13, %s4640_s4 }
 0x122   : > { %4166 = vmatprep.subr.msk.mxu1 %vm1383_vm2, %v4731_v9  ;;  %4179 = vmatmul.mubr.msk.f32.vlgmr.msra.gmra.mxu0 %vm1383_vm2, %v1613_v30  ;;  %p4038_p8 = scmp.ne.s32.totalorder %s5132_s22, 1 }
 0x123   : > { %1512 = vperm.xlu0 %4384, %v1494_v22  }
 0x124   : > { %4162 = vmatmul.mubr.msk.f32.gmra.mxu1 %vm1383_vm2, %v1358_v19  ;;  %1507 = vperm.xlu1 %4385, %v1493_v24  }
 0x125   : > { %4167 = vmatpush3.xpose.msk.msra.mxu1 %vm1383_vm2, %v4731_v9  ;;  %4168 = vmatprep.mubr.msk.f32.mxu1 %vm1383_vm2, %v1487_v21 }
 0x126   : > { %4336 = vmatprep.subr.msk.mxu1 %vm1383_vm2, %v4729_v8 }
 0x128   : > { %4169 = vmatmul.mubr.msk.f32.vlgmr.msra.gmra.mxu1 %vm1383_vm2, %v1488_v23 }
 0x129   : > { %4171 = vmatprep.mubr.msk.f32.mxu1 %vm1383_vm2, %v1489_v25  ;;  %4338 = vmatpush3.xpose.msk.msra.mxu1 %vm1383_vm2, %v4729_v8 }
 0x12a   : > { %4337 = vmatprep.subr.msk.mxu1 %vm1383_vm2, %v4731_v9 }
 0x12c   : > { %4172 = vmatmul.mubr.msk.f32.gmra.mxu1 %vm1383_vm2, %v1490_v26 }
 0x12d   : > { %4339 = vmatpush3.xpose.msk.msra.mxu1 %vm1383_vm2, %v4731_v9  ;;  %4181 = vmatprep.mubr.msk.f32.mxu1 %vm1383_vm2, %v1614_v27 }
 0x130   : > { %4182 = vmatmul.mubr.msk.f32.vlgmr.msra.gmra.mxu1 %vm1383_vm2, %v1615_v28 }
 0x190   : > { %v1366_v31 = vpop.permute.xlu0 %1365  ;;  %v1381_v32 = vpop.permute.xlu1 %1380 }
 0x196   : > { %v1371_v33 = vpop.permute.xlu0 %1370 }
 0x197   : > { %v1376_v36 = vpop.permute.xlu1 %1375 }
 0x19a   : > { %v1498_v44 = vpop.permute.xlu0 %1497 }
 0x19b   : > { %v1503_v42 = vpop.permute.xlu1 %1502 }
 0x19e   : > { %v1513_v53 = vpop.permute.xlu0 %1512 }
 0x19f   : > { %v1508_v50 = vpop.permute.xlu1 %1507 }
 0x1e0   : > { %v4160_v34 = vpop.f32.mrf.mxu1 }
 0x1e1   : > { %v1474_v35 = vadd.f32 %v4160_v34, %v1371_v33 }
 0x1e2   : > { %v1468_v37 = vpop.f32.mrf.mxu1  ;;  %v4816_v14 = vpop.f32.mrf.mxu0 }
 0x1e3   : > { %v1469_v38 = vadd.f32 %v1468_v37, %v1366_v31  ;;  %1769 = vxpose.xlu1.b32.start.end [1/1] (short) (narrow) %v1474_v35, 16  ;;  %v1616_v31 = vld [vmem:[%s5119_s18] sm:$0xff] }
 0x1e4   : > { %v4163_v39 = vpop.f32.mrf.mxu1  ;;  %v1718_v20 = vpop.f32.mrf.mxu0 }
 0x1e5   : > { %1737 = vxpose.xlu0.b32.start.end [1/1] (short) (narrow) %v1469_v38, 16  ;;  %v1484_v40 = vadd.f32 %v4163_v39, %v1381_v32  ;;  %v1617_v32 = vld [vmem:[%s5119_s18 + $0x8] sm:$0xff] }
 0x1e6   : > { %v1478_v41 = vpop.f32.mrf.mxu1 }
 0x1e7   : > { %v1479_v48 = vadd.f32 %v1478_v41, %v1376_v36 }
 0x1e8   : > { %v4170_v43 = vpop.f32.mrf.mxu1 }
 0x1e9   : > { %v1599_v49 = vadd.f32 %v4170_v43, %v1503_v42 }
 0x1ea   : > { %v1593_v45 = vpop.f32.mrf.mxu1  ;;  %1833 = vxpose.xlu0.b32.start.end [1/1] (short) (narrow) %v1484_v40, 16 }
 0x1eb   : > { %v1594_v46 = vadd.f32 %v1593_v45, %v1498_v44 }
 0x1ec   : > { %v4173_v47 = vpop.f32.mrf.mxu1 }
 0x1ed   : > { %4184 = vmatprep.subr.mxu1 %v1594_v46  ;;  %v1609_v57 = vadd.f32 %v4173_v47, %v1513_v53 }
 0x1ee   : > { %v1603_v51 = vpop.f32.mrf.mxu1  ;;  %4185 = vmatpush3.msra.mxu1 %v1594_v46 }
 0x1ef   : > { %v1604_v52 = vadd.f32 %v1603_v51, %v1508_v50  ;;  %4189 = vmatprep.subr.mxu1 %v1599_v49  ;;  %1801 = vxpose.xlu0.b32.start.end [1/1] (short) (narrow) %v1479_v48, 16 }
 0x1f0   : > { %v4805_v63 = vpop.f32.mrf.mxu1 }
 0x1f1   : > { %4194 = vmatprep.subr.mxu0 %v1604_v52 }
 0x1f2   : > { %4195 = vmatpush3.msra.mxu0 %v1604_v52  ;;  %v4807_v0 = vpop.f32.mrf.mxu1 }
 0x25f   : > { %v1785_v55 = vpop.trf.xlu1 }
 0x261   : > { %v1753_v54 = vpop.trf.xlu0 }
 0x262   : > { %4186 = vmatprep.mubr.msk.f32.mxu1 %vm1867_vm3, %v1753_v54 }
 0x263   : > { %v1786_v58 = vpop.trf.xlu1 }
 0x265   : > { %v1754_v56 = vpop.trf.xlu0 }
 0x266   : > { %4187 = vmatmul.mubr.msk.f32.vlgmr.msra.gmra.mxu1 %vm1867_vm3, %v1754_v56 }
 0x267   : > { %4190 = vmatpush3.msra.mxu1 %v1599_v49  ;;  %4191 = vmatprep.mubr.msk.f32.mxu1 %vm1867_vm3, %v1785_v55 }
 0x268   : > { %4199 = vmatprep.subr.mxu1 %v1609_v57 }
 0x269   : > { %v1849_v59 = vpop.trf.xlu0 }
 0x26a   : > { %4192 = vmatmul.mubr.msk.f32.vlgmr.msra.gmra.mxu1 %vm1867_vm3, %v1786_v58 }
 0x26b   : > { %4200 = vmatpush3.msra.mxu1 %v1609_v57  ;;  %4201 = vmatprep.mubr.msk.f32.mxu1 %vm1867_vm3, %v1849_v59 }
 0x26d   : > { %v1850_v60 = vpop.trf.xlu0 }
 0x26e   : > { %4202 = vmatmul.mubr.msk.f32.vlgmr.msra.gmra.mxu1 %vm1867_vm3, %v1850_v60 }
 0x271   : > { %v1817_v61 = vpop.trf.xlu0 }
 0x272   : > { %4196 = vmatprep.mubr.msk.f32.mxu0 %vm1867_vm3, %v1817_v61 }
 0x275   : > { %v1818_v62 = vpop.trf.xlu0 }
 0x276   : > { %4197 = vmatmul.mubr.msk.f32.vlgmr.msra.gmra.mxu0 %vm1867_vm3, %v1818_v62 }
 0x326   : > { %v4188_v1 = vpop.f32.mrf.mxu1 }
 0x327   : > { %v1946_v15 = vadd.f32 %v4188_v1, %v1866_v5 }
 0x328   : > { %v1940_v3 = vpop.f32.mrf.mxu1 }
 0x329   : > { %v1941_v4 = vadd.f32 %v1940_v3, %v1865_v2  ;;  %v2196_v22 = vsel %vm2192_vm4, %v1946_v15, -inf }
 0x32a   : > { %v4193_v6 = vpop.f32.mrf.mxu1 }
 0x32b   : > { %v2027_v7 = vadd.f32 %v4193_v6, %v1866_v5  ;;  %v2193_v10 = vsel %vm2192_vm4, %v1941_v4, -inf }
 0x32c   : > { %v2021_v11 = vpop.f32.mrf.mxu1  ;;  %2194 = vmax.xlane.f32.xlu1 %v2193_v10 }
 0x32d   : > { %v2022_v12 = vadd.f32 %v2021_v11, %v1865_v2  ;;  %v2202_v17 = vsel %vm2192_vm4, %v2027_v7, -inf }
 0x32e   : > { %v4203_v13 = vpop.f32.mrf.mxu1 }
 0x32f   : > { %v2199_v16 = vsel %vm2192_vm4, %v2022_v12, -inf  ;;  %v2189_v21 = vadd.f32 %v4203_v13, %v1866_v5 }
 0x330   : > { %2200 = vmax.xlane.f32.xlu0 %v2199_v16  ;;  %2203 = vmax.xlane.f32.xlu1 %v2202_v17  ;;  %v2183_v18 = vpop.f32.mrf.mxu1  ;;  %v1619_v17 = vld [vmem:[%s5119_s18 + $0x18] sm:$0xff] }
 0x331   : > { %v2184_v19 = vadd.f32 %v2183_v18, %v1865_v2  ;;  %v2214_v26 = vsel %vm2192_vm4, %v2189_v21, -inf  ;;  %v1618_v18 = vld [vmem:[%s5119_s18 + $0x10] sm:$0xff]  ;;  %s5134_s18 = sld [smem:[#allocation33_spill]] (!%p4038_p8) }
 0x333   : > { %v2211_v23 = vsel %vm2192_vm4, %v2184_v19, -inf }
 0x334   : > { %2197 = vmax.xlane.f32.xlu0 %v2196_v22  ;;  %2212 = vmax.xlane.f32.xlu1 %v2211_v23 }
 0x336   : > { %v4198_v24 = vpop.f32.mrf.mxu0 }
 0x337   : > { %v2108_v25 = vadd.f32 %v4198_v24, %v1866_v5 }
 0x338   : > { %2215 = vmax.xlane.f32.xlu1 %v2214_v26  ;;  %v2102_v27 = vpop.f32.mrf.mxu0 }
 0x339   : > { %v2103_v28 = vadd.f32 %v2102_v27, %v1865_v2  ;;  %v2208_v29 = vsel %vm2192_vm4, %v2108_v25, -inf }
 0x33b   : > { %v2205_v30 = vsel %vm2192_vm4, %v2103_v28, -inf }
 0x33c   : > { %2209 = vmax.xlane.f32.xlu1 %v2208_v29  ;;  %2206 = vmax.xlane.f32.xlu0 %v2205_v30 }
 0x34d   : > { %1622 = vperm.xlu1 %4385, %v1616_v31  }
 0x352   : > { %1627 = vperm.xlu0 %4384, %v1617_v32  }
 0x3b5   : > { %v2195_v33 = vpop.xlane.xlu1 %2194 }
 0x3b6   : > { %v2217_v38 = vsub.f32 %v1941_v4, %v2195_v33 }
 0x3b8   : > { %v2225_v43 = vmul.f32 1.442695, %v2217_v38 }
 0x3b9   : > { %v2204_v34 = vpop.xlane.xlu1 %2203  ;;  %v2201_v35 = vpop.xlane.xlu0 %2200 }
 0x3ba   : > { %v2220_v36 = vsub.f32 %v2027_v7, %v2204_v34  ;;  %v2219_v44 = vsub.f32 %v2022_v12, %v2201_v35 }
 0x3bc   : > { %v2231_v37 = vmul.f32 1.442695, %v2220_v36  ;;  %v2229_v47 = vmul.f32 1.442695, %v2219_v44 }
 0x3bd   : > { %v2213_v39 = vpop.xlane.xlu1 %2212  ;;  %v2198_v40 = vpop.xlane.xlu0 %2197 }
 0x3be   : > { %4386 = vpow2.f32 %v2231_v37  ;;  %v2218_v41 = vsub.f32 %v1946_v15, %v2198_v40  ;;  %v2223_v52 = vsub.f32 %v2184_v19, %v2213_v39 }
 0x3c0   : > { %v2227_v42 = vmul.f32 1.442695, %v2218_v41  ;;  %v2237_v59 = vmul.f32 1.442695, %v2223_v52 }
 0x3c1   : > { %v2216_v45 = vpop.xlane.xlu1 %2215 }
 0x3c2   : > { %4388 = vpow2.f32 %v2227_v42  ;;  %v2224_v46 = vsub.f32 %v2189_v21, %v2216_v45  ;;  %v2617_v45 = vld [vmem:[%s5121_s1] sm:$0xff] }
 0x3c3   : > { %4390 = vpow2.f32 %v2225_v43 }
 0x3c4   : > { %v2239_v53 = vmul.f32 1.442695, %v2224_v46  ;;  %4392 = vpow2.f32 %v2229_v47  ;;  %v2755_v46 = vld [vmem:[%s5120_s7] sm:$0xff] }
 0x3c5   : > { %v2210_v48 = vpop.xlane.xlu1 %2209  ;;  %v2207_v49 = vpop.xlane.xlu0 %2206 }
 0x3c6   : > { %v2222_v50 = vsub.f32 %v2108_v25, %v2210_v48  ;;  %v2221_v51 = vsub.f32 %v2103_v28, %v2207_v49 }
 0x3c8   : > { %v2235_v54 = vmul.f32 1.442695, %v2222_v50  ;;  %v2233_v55 = vmul.f32 1.442695, %v2221_v51 }
 0x3c9   : > { %v1623_v56 = vpop.permute.xlu1 %1622 }
 0x3ca   : > { %4394 = vpow2.f32 %v2235_v54  ;;  %v1719_v57 = vadd.f32 %v1718_v20, %v1623_v56  ;;  %v2619_v56 = vld [vmem:[%s5121_s1 + $0x10] sm:$0xff] }
 0x3cb   : > { %v4827_v58 = vpop.eup %4386  ;;  %4396 = vpow2.f32 %v2239_v53 }
 0x3cc   : > { %4204 = vmatprep.subr.msk.mxu0 %vm2192_vm4, %v1719_v57  ;;  %v2250_v60 = vsel %vm2192_vm4, %v4827_v58, 0.0  ;;  %4398 = vpow2.f32 %v2233_v55  ;;  %v2618_v55 = vld [vmem:[%s5121_s1 + $0x8] sm:$0xff] }
 0x3cd   : > { %2251 = vadd.xlane.f32.xlu1 %v2250_v60  ;;  %4205 = vmatpush3.xpose.msk.msra.mxu0 %vm2192_vm4, %v1719_v57  ;;  %v1628_v61 = vpop.permute.xlu0 %1627  ;;  %4400 = vpow2.f32 %v2237_v59  ;;  %v2620_v57 = vld [vmem:[%s5121_s1 + $0x18] sm:$0xff]  ;;  %v2622_v59 = vld [vmem:[%s5121_s1 + $0x28] sm:$0xff]  ;;  %v2623_v60 = vld [vmem:[%s5121_s1 + $0x30] sm:$0xff] }
 0x3ce   : > { %v1724_v62 = vadd.f32 %v4816_v14, %v1628_v61  ;;  %v2624_v61 = vld [vmem:[%s5121_s1 + $0x38] sm:$0xff] }
 0x3cf   : > { %v4389_v1 = vpop.eup %4388 }
 0x3d0   : > { %4209 = vmatprep.subr.msk.mxu1 %vm2192_vm4, %v1724_v62  ;;  %v2244_v2 = vsel %vm2192_vm4, %v4389_v1, 0.0  ;;  %v4391_v3 = vpop.eup %4390 }
 0x3d1   : > { %4210 = vmatpush3.xpose.msk.msra.mxu1 %vm2192_vm4, %v1724_v62  ;;  %2245 = vadd.xlane.f32.xlu0 %v2244_v2  ;;  %v2241_v4 = vsel %vm2192_vm4, %v4391_v3, 0.0  ;;  %v4393_v5 = vpop.eup %4392  ;;  %v2756_v62 = vld [vmem:[%s5120_s7 + $0x8] sm:$0xff] }
 0x3d2   : > { %v2247_v11 = vsel %vm2192_vm4, %v4393_v5, 0.0 }
 0x3d5   : > { %2242 = vadd.xlane.f32.xlu0 %v2241_v4 }
 0x3d7   : > { %v4395_v6 = vpop.eup %4394 }
 0x3d8   : > { %v2256_v7 = vsel %vm2192_vm4, %v4395_v6, 0.0  ;;  %v4397_v10 = vpop.eup %4396 }
 0x3d9   : > { %2257 = vadd.xlane.f32.xlu1 %v2256_v7  ;;  %v4399_v12 = vpop.eup %4398  ;;  %2248 = vadd.xlane.f32.xlu0 %v2247_v11  ;;  %v2262_v13 = vsel %vm2192_vm4, %v4397_v10, 0.0 }
 0x3da   : > { %v4401_v14 = vpop.eup %4400  ;;  %v2253_v15 = vsel %vm2192_vm4, %v4399_v12, 0.0 }
 0x3db   : > { %v2259_v16 = vsel %vm2192_vm4, %v4401_v14, 0.0 }
 0x3dd   : > { %2263 = vadd.xlane.f32.xlu1 %v2262_v13  ;;  %2254 = vadd.xlane.f32.xlu0 %v2253_v15 }
 0x3e1   : > { %2260 = vadd.xlane.f32.xlu1 %v2259_v16 }
 0x3f2   : > { %1637 = vperm.xlu1 %4385, %v1619_v17  }
 0x3f3   : > { %1632 = vperm.xlu0 %4384, %v1618_v18  }
 0x456   : > { %v2252_v20 = vpop.xlane.xlu1 %2251 }
 0x45a   : > { %v2246_v19 = vpop.xlane.xlu0 %2245 }
 0x45b   : > { %4402 = vrcp.f32 %v2246_v19 }
 0x45e   : > { %v2243_v21 = vpop.xlane.xlu0 %2242 }
 0x45f   : > { %4404 = vrcp.f32 %v2243_v21 }
 0x460   : > { %4406 = vrcp.f32 %v2252_v20 }
 0x462   : > { %v2258_v22 = vpop.xlane.xlu1 %2257  ;;  %v2249_v23 = vpop.xlane.xlu0 %2248 }
 0x463   : > { %4408 = vrcp.f32 %v2249_v23 }
 0x464   : > { %4410 = vrcp.f32 %v2258_v22 }
 0x466   : > { %v2264_v24 = vpop.xlane.xlu1 %2263  ;;  %v2255_v25 = vpop.xlane.xlu0 %2254 }
 0x467   : > { %4412 = vrcp.f32 %v2255_v25 }
 0x468   : > { %4414 = vrcp.f32 %v2264_v24  ;;  %v4403_v27 = vpop.eup %4402 }
 0x469   : > { %v2274_v33 = vmul.f32 %v4403_v27, %v4389_v1 }
 0x46a   : > { %v2261_v26 = vpop.xlane.xlu1 %2260 }
 0x46b   : > { %4416 = vrcp.f32 %v2261_v26 }
 0x46c   : > { %v4405_v28 = vpop.eup %4404 }
 0x46d   : > { %v2273_v30 = vmul.f32 %v4405_v28, %v4391_v3  ;;  %v4407_v34 = vpop.eup %4406  ;;  %v2757_v3 = vld [vmem:[%s5120_s7 + $0x10] sm:$0xff] }
 0x46e   : > { %v1638_v29 = vpop.permute.xlu1 %1637  ;;  %v1633_v32 = vpop.permute.xlu0 %1632  ;;  %v2276_v38 = vmul.f32 %v4407_v34, %v4827_v58  ;;  %v2621_v58 = vld [vmem:[%s5121_s1 + $0x20] sm:$0xff] }
 0x46f   : > { %v1734_v31 = vadd.f32 %v4805_v63, %v1638_v29  ;;  %v1729_v35 = vadd.f32 %v4807_v0, %v1633_v32  ;;  %4206 = vmatprep.mubr.msk.f32.mxu0 %vm2192_vm4, %v2273_v30  ;;  %v4029_v30 = vld [vmem:[%s5122_s28] ss:$0 sm:$0xff]  ;;  %s5133_s28 = sld [smem:[#allocation34_spill]] (!%p4038_p8) }
 0x470   : > { %v4409_v36 = vpop.eup %4408  ;;  %4207 = vmatmul.mubr.msk.f32.vlgmr.msra.gmra.mxu0 %vm2192_vm4, %v2274_v33 }
 0x471   : > { %4219 = vmatprep.subr.msk.mxu1 %vm2192_vm4, %v1734_v31  ;;  %4214 = vmatprep.subr.msk.mxu0 %vm2192_vm4, %v1729_v35  ;;  %v2275_v37 = vmul.f32 %v4409_v36, %v4393_v5  ;;  %v4411_v63 = vpop.eup %4410 }
 0x472   : > { %4215 = vmatpush3.xpose.msk.msra.mxu0 %vm2192_vm4, %v1729_v35  ;;  %v2278_v41 = vmul.f32 %v4411_v63, %v4395_v6  ;;  %v2758_v6 = vld [vmem:[%s5120_s7 + $0x18] sm:$0xff]  ;;  %s5123_s7 = sld [smem:[#allocation24_spill]] }
 0x473   : > { %4211 = vmatprep.mubr.msk.f32.mxu1 %vm2192_vm4, %v2275_v37 }
 0x474   : > { %v4413_v39 = vpop.eup %4412  ;;  %4212 = vmatmul.mubr.msk.f32.vlgmr.msra.gmra.mxu1 %vm2192_vm4, %v2276_v38 }
 0x475   : > { %4220 = vmatpush3.xpose.msk.msra.mxu1 %vm2192_vm4, %v1734_v31  ;;  %v2277_v0 = vmul.f32 %v4413_v39, %v4399_v12  ;;  %v4415_v40 = vpop.eup %4414 }
 0x476   : > { %v2280_v44 = vmul.f32 %v4415_v40, %v4397_v10  ;;  %4252 = vmatprep.subr.mxu1 %v2755_v46 }
 0x477   : > { %4216 = vmatprep.mubr.msk.f32.mxu0 %vm2192_vm4, %v2277_v0 }
 0x478   : > { %v4417_v42 = vpop.eup %4416  ;;  %4217 = vmatmul.mubr.msk.f32.vlgmr.msra.gmra.mxu0 %vm2192_vm4, %v2278_v41  ;;  %s5124_s0 = scalar_lea.vmem %s5123_s7, %s4640_s4 }
 0x479   : > { %v2279_v43 = vmul.f32 %v4417_v42, %v4401_v14  ;;  %4240 = vmatprep.mubr.msk.f32.mxu0 %vm2625_vm5, %v2617_v45 }
 0x47b   : > { %4221 = vmatprep.mubr.msk.f32.mxu1 %vm2192_vm4, %v2279_v43 }
 0x47c   : > { %4222 = vmatmul.mubr.msk.f32.vlgmr.msra.gmra.mxu1 %vm2192_vm4, %v2280_v44 }
 0x47d   : > { %4253 = vmatpush3.msra.mxu1 %v2755_v46 }
 0x47e   : > { %4257 = vmatprep.subr.mxu1 %v2756_v62 }
 0x530   : > { %v4208_v48 = vpop.f32.mrf.mxu0 }
 0x532   : > { %v2356_v50 = vpop.f32.mrf.mxu0 }
 0x534   : > { %v4213_v47 = vpop.f32.mrf.mxu1 }
 0x536   : > { %v2440_v49 = vpop.f32.mrf.mxu1 }
 0x538   : > { %v4218_v52 = vpop.f32.mrf.mxu0 }
 0x53a   : > { %v2524_v54 = vpop.f32.mrf.mxu0 }
 0x53c   : > { %v4223_v51 = vpop.f32.mrf.mxu1 }
 0x53d   : > { %4224 = vmatprep.subr.mxu0 %v4223_v51 }
 0x53e   : > { %v2608_v53 = vpop.f32.mrf.mxu1  ;;  %4225 = vmatpush3.msra.mxu0 %v4223_v51  ;;  %v3153_v51 = vld [vmem:[%s4700_s6] sm:$0xff] }
 0x53f   : > { %4226 = vmatprep.subr.mxu0 %v2608_v53 }
 0x540   : > { %4227 = vmatpush3.msra.mxu0 %v2608_v53  ;;  %v3261_v53 = vld [vmem:[%s4719_s27 + $0x70] sm:$0xff] }
 0x541   : > { %4228 = vmatprep.subr.mxu0 %v4218_v52 }
 0x542   : > { %4229 = vmatpush3.msra.mxu0 %v4218_v52  ;;  %v3262_v52 = vld [vmem:[%s4719_s27 + $0x78] sm:$0xff] }
 0x543   : > { %4230 = vmatprep.subr.mxu0 %v2524_v54 }
 0x544   : > { %4231 = vmatpush3.msra.mxu0 %v2524_v54  ;;  %v3260_v54 = vld [vmem:[%s4719_s27 + $0x68] sm:$0xff] }
 0x545   : > { %4232 = vmatprep.subr.mxu0 %v4213_v47 }
 0x546   : > { %4233 = vmatpush3.msra.mxu0 %v4213_v47 }
 0x547   : > { %4234 = vmatprep.subr.mxu0 %v2440_v49 }
 0x548   : > { %4235 = vmatpush3.msra.mxu0 %v2440_v49  ;;  %v3155_v49 = vld [vmem:[%s4700_s6 + $0x10] sm:$0xff] }
 0x549   : > { %4236 = vmatprep.subr.mxu0 %v4208_v48 }
 0x54a   : > { %4237 = vmatpush3.msra.mxu0 %v4208_v48  ;;  %v3156_v48 = vld [vmem:[%s4700_s6 + $0x18] sm:$0xff] }
 0x54b   : > { %4238 = vmatprep.subr.mxu0 %v2356_v50 }
 0x54c   : > { %4239 = vmatpush3.msra.mxu0 %v2356_v50  ;;  %v3154_v50 = vld [vmem:[%s4700_s6 + $0x8] sm:$0xff] }
 0x54d   : > { %4241 = vmatmul.mubr.msk.f32.vlgmr.msra.gmra.mxu0 %vm2625_vm5, %v2618_v55  ;;  %4283 = vmatprep.subr.mxu0 %v3262_v52  ;;  %v3259_v55 = vld [vmem:[%s4719_s27 + $0x60] sm:$0xff] }
 0x54e   : > { %4243 = vmatprep.mubr.msk.f32.mxu0 %vm2625_vm5, %v2619_v56  ;;  %4284 = vmatpush3.msra.mxu0 %v3262_v52  ;;  %v3258_v56 = vld [vmem:[%s4719_s27 + $0x58] sm:$0xff] }
 0x54f   : > { %4285 = vmatprep.subr.mxu0 %v3261_v53 }
 0x550   : > { %4286 = vmatpush3.msra.mxu0 %v3261_v53  ;;  %v4036_v53 = vld [vmem:[%s5130_s17] ss:$0 sm:$0xff] }
 0x551   : > { %4244 = vmatmul.mubr.msk.f32.gmra.mxu0 %vm2625_vm5, %v2620_v57  ;;  %4287 = vmatprep.subr.mxu0 %v3260_v54  ;;  %v3257_v57 = vld [vmem:[%s4719_s27 + $0x50] sm:$0xff] }
 0x552   : > { %4246 = vmatprep.mubr.msk.f32.mxu0 %vm2625_vm5, %v2621_v58  ;;  %4288 = vmatpush3.msra.mxu0 %v3260_v54  ;;  %v3256_v58 = vld [vmem:[%s4719_s27 + $0x48] sm:$0xff] }
 0x553   : > { %4289 = vmatprep.subr.mxu0 %v3259_v55 }
 0x554   : > { %4290 = vmatpush3.msra.mxu0 %v3259_v55 }
 0x555   : > { %4247 = vmatmul.mubr.msk.f32.gmra.mxu0 %vm2625_vm5, %v2622_v59  ;;  %4291 = vmatprep.subr.mxu0 %v3258_v56  ;;  %v3255_v59 = vld [vmem:[%s4719_s27 + $0x40] sm:$0xff] }
 0x556   : > { %4249 = vmatprep.mubr.msk.f32.mxu0 %vm2625_vm5, %v2623_v60  ;;  %4292 = vmatpush3.msra.mxu0 %v3258_v56  ;;  %v3254_v60 = vld [vmem:[%s4719_s27 + $0x38] sm:$0xff]  ;;  %v4037_v56 = vld [vmem:[%s5131_s25] ss:$0 sm:$0xff] }
 0x557   : > { %4293 = vmatprep.subr.mxu0 %v3257_v57 }
 0x558   : > { %4294 = vmatpush3.msra.mxu0 %v3257_v57 }
 0x559   : > { %4250 = vmatmul.mubr.msk.f32.gmra.mxu0 %vm2625_vm5, %v2624_v61  ;;  %4295 = vmatprep.subr.mxu0 %v3256_v58  ;;  %v3253_v61 = vld [vmem:[%s4719_s27 + $0x30] sm:$0xff] }
 0x55a   : > { %4296 = vmatpush3.msra.mxu0 %v3256_v58 }
 0x55b   : > { %4297 = vmatprep.subr.mxu0 %v3255_v59 }
 0x55c   : > { %4298 = vmatpush3.msra.mxu0 %v3255_v59 }
 0x55d   : > { %4299 = vmatprep.subr.mxu0 %v3254_v60 }
 0x55e   : > { %4300 = vmatpush3.msra.mxu0 %v3254_v60 }
 0x55f   : > { %4301 = vmatprep.subr.mxu0 %v3253_v61 }
 0x560   : > { %4302 = vmatpush3.msra.mxu0 %v3253_v61 }
 0x60d   : > { %v4242_v1 = vpop.f32.mrf.mxu0 }
 0x60f   : > { %v2716_v2 = vpop.f32.mrf.mxu0 }
 0x610   : > { %4254 = vmatprep.mubr.msk.f32.mxu1 %vm1867_vm3, %v2716_v2 }
 0x611   : > { %v4245_v4 = vpop.f32.mrf.mxu0  ;;  %4255 = vmatmul.mubr.msk.f32.vlgmr.msra.gmra.mxu1 %vm1867_vm3, %v4242_v1  ;;  %v3251_v1 = vld [vmem:[%s4719_s27 + $0x20] sm:$0xff] }
 0x612   : > { %4258 = vmatpush3.msra.mxu1 %v2756_v62  ;;  %v3252_v62 = vld [vmem:[%s4719_s27 + $0x28] sm:$0xff] }
 0x613   : > { %v2726_v5 = vpop.f32.mrf.mxu0  ;;  %4262 = vmatprep.subr.mxu1 %v2757_v3  ;;  %4303 = vmatprep.subr.mxu0 %v3252_v62 }
 0x614   : > { %4259 = vmatprep.mubr.msk.f32.mxu1 %vm1867_vm3, %v2726_v5  ;;  %4304 = vmatpush3.msra.mxu0 %v3252_v62 }
 0x615   : > { %v4248_v7 = vpop.f32.mrf.mxu0  ;;  %4260 = vmatmul.mubr.msk.f32.vlgmr.msra.gmra.mxu1 %vm1867_vm3, %v4245_v4  ;;  %4305 = vmatprep.subr.mxu0 %v3251_v1 }
 0x616   : > { %4263 = vmatpush3.msra.mxu1 %v2757_v3  ;;  %4306 = vmatpush3.msra.mxu0 %v3251_v1 }
 0x617   : > { %v2736_v10 = vpop.f32.mrf.mxu0  ;;  %4267 = vmatprep.subr.mxu1 %v2758_v6 }
 0x618   : > { %4264 = vmatprep.mubr.msk.f32.mxu1 %vm1867_vm3, %v2736_v10 }
 0x619   : > { %v4251_v11 = vpop.f32.mrf.mxu0  ;;  %4265 = vmatmul.mubr.msk.f32.vlgmr.msra.gmra.mxu1 %vm1867_vm3, %v4248_v7 }
 0x61a   : > { %4268 = vmatpush3.msra.mxu1 %v2758_v6 }
 0x61b   : > { %v2746_v12 = vpop.f32.mrf.mxu0  ;;  %4272 = vmatprep.subr.mxu1 %v3156_v48 }
 0x61c   : > { %4269 = vmatprep.mubr.msk.f32.mxu1 %vm1867_vm3, %v2746_v12 }
 0x61d   : > { %4270 = vmatmul.mubr.msk.f32.vlgmr.msra.gmra.mxu1 %vm1867_vm3, %v4251_v11  ;;  %v4030_v11 = vld [vmem:[%s5124_s0] ss:$0 sm:$0xff] }
 0x61e   : > { %4273 = vmatpush3.msra.mxu1 %v3156_v48 }
 0x61f   : > { %4274 = vmatprep.subr.mxu1 %v3155_v49 }
 0x620   : > { %4275 = vmatpush3.msra.mxu1 %v3155_v49 }
 0x621   : > { %4276 = vmatprep.subr.mxu1 %v3154_v50 }
 0x622   : > { %4277 = vmatpush3.msra.mxu1 %v3154_v50 }
 0x623   : > { %4278 = vmatprep.subr.mxu1 %v3153_v51 }
 0x624   : > { %4279 = vmatpush3.msra.mxu1 %v3153_v51 }
 0x6d1   : > { %v4256_v13 = vpop.f32.mrf.mxu1 }
 0x6d2   : > { %v3090_v19 = vsel %vm1383_vm2, %v4256_v13, 0.0 }
 0x6d3   : > { %v2831_v14 = vpop.f32.mrf.mxu1 }
 0x6d4   : > { %v3083_v24 = vsel %vm1383_vm2, %v2831_v14, 0.0 }
 0x6d5   : > { %v4261_v15 = vpop.f32.mrf.mxu1 }
 0x6d6   : > { %v3091_v17 = vsel %vm1383_vm2, %v4261_v15, 0.0 }
 0x6d7   : > { %v2912_v16 = vpop.f32.mrf.mxu1  ;;  %v3092_v22 = vadd.f32 %v3091_v17, %v3090_v19 }
 0x6d8   : > { %v3084_v20 = vsel %vm1383_vm2, %v2912_v16, 0.0  ;;  %v4031_v16 = vld [vmem:[%s5126_s9] ss:$0 sm:$0xff] }
 0x6d9   : > { %v4266_v18 = vpop.f32.mrf.mxu1  ;;  %v3085_v26 = vadd.f32 %v3084_v20, %v3083_v24  ;;  %v3250_v20 = vld [vmem:[%s4719_s27 + $0x18] sm:$0xff]  ;;  %v4032_v24 = vld [vmem:[%s1233_s29] ss:$0 sm:$0xff] }
 0x6da   : > { %v3093_v21 = vsel %vm1383_vm2, %v4266_v18, 0.0  ;;  %4307 = vmatprep.subr.mxu0 %v3250_v20 }
 0x6db   : > { %v2993_v23 = vpop.f32.mrf.mxu1  ;;  %v3094_v27 = vadd.f32 %v3093_v21, %v3092_v22  ;;  %4308 = vmatpush3.msra.mxu0 %v3250_v20  ;;  %v3249_v21 = vld [vmem:[%s4719_s27 + $0x10] sm:$0xff]  ;;  %v3248_v22 = vld [vmem:[%s4719_s27 + $0x8] sm:$0xff] }
 0x6dc   : > { %v3086_v25 = vsel %vm1383_vm2, %v2993_v23, 0.0  ;;  %4309 = vmatprep.subr.mxu0 %v3249_v21  ;;  %v3247_v23 = vld [vmem:[%s4719_s27] sm:$0xff] }
 0x6dd   : > { %v4271_v28 = vpop.f32.mrf.mxu1  ;;  %v3087_v31 = vadd.f32 %v3086_v25, %v3085_v26  ;;  %4310 = vmatpush3.msra.mxu0 %v3249_v21 }
 0x6de   : > { %v3095_v29 = vsel %vm1383_vm2, %v4271_v28, 0.0  ;;  %4311 = vmatprep.subr.mxu0 %v3248_v22 }
 0x6df   : > { %v3096_v32 = vadd.f32 %v3095_v29, %v3094_v27  ;;  %v3074_v33 = vpop.f32.mrf.mxu1  ;;  %4312 = vmatpush3.msra.mxu0 %v3248_v22 }
 0x6e0   : > { %v3088_v34 = vsel %vm1383_vm2, %v3074_v33, 0.0  ;;  %4313 = vmatprep.subr.mxu0 %v3247_v23 }
 0x6e1   : > { %v3105_v35 = vadd.f32 %v4029_v30, %v3096_v32  ;;  %v3089_v36 = vadd.f32 %v3088_v34, %v3087_v31  ;;  %4314 = vmatpush3.msra.mxu0 %v3247_v23  ;;  %v4035_v31 = vld [vmem:[%s1249_s24] ss:$0 sm:$0xff] }
 0x6e3   : > { %v3104_v37 = vadd.f32 %v4029_v30, %v3089_v36  ;;  %v3107_v38 = vadd.f32 %v3105_v35, %v4729_v8 }
 0x6e5   : > { %v3113_v63 = vsel %vm1383_vm2, %v3107_v38, 0.0  ;;  %v3106_v39 = vadd.f32 %v3104_v37, %v4731_v9 }
 0x6e6   : > { %3114 = vadd.xlane.f32.xlu0 %v3113_v63 }
 0x6e7   : > { %v3110_v0 = vsel %vm1383_vm2, %v3106_v39, 0.0 }
 0x6e8   : > { %3111 = vadd.xlane.f32.xlu1 %v3110_v0 }
 0x76f   : > { %v3115_v40 = vpop.xlane.xlu0 %3114 }
 0x770   : > { %v3118_v41 = vmul.f32 0.03125, %v3115_v40 }
 0x771   : > { %v3112_v42 = vpop.xlane.xlu1 %3111 }
 0x772   : > { %v4921_v43 = vsub.f32 %v3107_v38, %v3118_v41  ;;  %v3117_v44 = vmul.f32 0.03125, %v3112_v42 }
 0x774   : > { %v4923_v45 = vsub.f32 %v3106_v39, %v3117_v44  ;;  %v3122_v8 = vmul.f32 %v4921_v43, %v4921_v43 }
 0x776   : > { %v3126_v9 = vsel %vm1383_vm2, %v3122_v8, 0.0  ;;  %v3121_v46 = vmul.f32 %v4923_v45, %v4923_v45 }
 0x777   : > { %3127 = vadd.xlane.f32.xlu1 %v3126_v9 }
 0x778   : > { %v3123_v47 = vsel %vm1383_vm2, %v3121_v46, 0.0 }
 0x779   : > { %3124 = vadd.xlane.f32.xlu0 %v3123_v47 }
 0x800   : > { %v3128_v2 = vpop.xlane.xlu1 %3127 }
 0x801   : > { %v3130_v3 = vmul.f32 0.03125, %v3128_v2 }
 0x802   : > { %v3125_v4 = vpop.xlane.xlu0 %3124 }
 0x803   : > { %v3132_v5 = vadd.f32 1e-05, %v3130_v3  ;;  %v3129_v6 = vmul.f32 0.03125, %v3125_v4 }
 0x805   : > { %4418 = vrsqrt.f32 %v3132_v5  ;;  %v3131_v7 = vadd.f32 1e-05, %v3129_v6 }
 0x807   : > { %4420 = vrsqrt.f32 %v3131_v7 }
 0x812   : > { %v4419_v10 = vpop.eup %4418 }
 0x813   : > { %v3136_v12 = vmul.f32 %v4419_v10, %v4921_v43 }
 0x814   : > { %v4421_v13 = vpop.eup %4420 }
 0x815   : > { %v3135_v14 = vmul.f32 %v4421_v13, %v4923_v45  ;;  %v3144_v15 = vmul.f32 %v4030_v11, %v3136_v12 }
 0x817   : > { %v3143_v17 = vmul.f32 %v4030_v11, %v3135_v14  ;;  %v3152_v19 = vadd.f32 %v4031_v16, %v3144_v15 }
 0x819   : > { %v3151_v18 = vadd.f32 %v4031_v16, %v3143_v17 }
 0x81b   : > { %4280 = vmatprep.mubr.msk.f32.mxu1 %vm1383_vm2, %v3151_v18 }
 0x81c   : > { %4281 = vmatmul.mubr.msk.f32.vlgmr.msra.gmra.mxu1 %vm1383_vm2, %v3152_v19 }
 0x8dc   : > { %v4282_v25 = vpop.f32.mrf.mxu1 }
 0x8dd   : > { %v3242_v26 = vadd.f32 %v4282_v25, %v4032_v24 }
 0x8de   : > { %v3236_v27 = vpop.f32.mrf.mxu1 }
 0x8df   : > { %v3237_v28 = vadd.f32 %v4032_v24, %v3236_v27  ;;  %v3246_v30 = vmax.f32 %v3242_v26, 0.0 }
 0x8e1   : > { %v3245_v29 = vmax.f32 %v3237_v28, 0.0 }
 0x8e3   : > { %4315 = vmatprep.mubr.f32.mxu0 %v3245_v29 }
 0x8e4   : > { %4316 = vmatmul.mubr.f32.vlgmr.msra.gmra.mxu0 %v3246_v30 }
 0x9a4   : > { %v4317_v32 = vpop.f32.mrf.mxu0 }
 0x9a5   : > { %v3342_v33 = vadd.f32 %v4317_v32, %v4035_v31 }
 0x9a6   : > { %v3336_v34 = vpop.f32.mrf.mxu0 }
 0x9a7   : > { %v3337_v35 = vadd.f32 %v4035_v31, %v3336_v34  ;;  %v3346_v36 = vadd.f32 %v3342_v33, %v3152_v19 }
 0x9a9   : > { %v3352_v37 = vsel %vm1383_vm2, %v3346_v36, 0.0  ;;  %v3345_v38 = vadd.f32 %v3337_v35, %v3151_v18 }
 0x9aa   : > { %3353 = vadd.xlane.f32.xlu1 %v3352_v37 }
 0x9ab   : > { %v3349_v63 = vsel %vm1383_vm2, %v3345_v38, 0.0 }
 0x9ac   : > { %3350 = vadd.xlane.f32.xlu0 %v3349_v63 }
 0xa33   : > { %v3354_v39 = vpop.xlane.xlu1 %3353 }
 0xa34   : > { %v3356_v0 = vmul.f32 0.03125, %v3354_v39 }
 0xa35   : > { %v3351_v40 = vpop.xlane.xlu0 %3350 }
 0xa36   : > { %v3358_v41 = vsub.f32 %v3346_v36, %v3356_v0  ;;  %v3355_v42 = vmul.f32 0.03125, %v3351_v40 }
 0xa38   : > { %v3357_v43 = vsub.f32 %v3345_v38, %v3355_v42  ;;  %v3360_v44 = vmul.f32 %v3358_v41, %v3358_v41 }
 0xa3a   : > { %v3364_v45 = vsel %vm1383_vm2, %v3360_v44, 0.0  ;;  %v3359_v8 = vmul.f32 %v3357_v43, %v3357_v43 }
 0xa3b   : > { %3365 = vadd.xlane.f32.xlu1 %v3364_v45 }
 0xa3c   : > { %v3361_v9 = vsel %vm1383_vm2, %v3359_v8, 0.0 }
 0xa3d   : > { %3362 = vadd.xlane.f32.xlu0 %v3361_v9 }
 0xac4   : > { %v3366_v46 = vpop.xlane.xlu1 %3365 }
 0xac5   : > { %v3368_v47 = vmul.f32 0.03125, %v3366_v46 }
 0xac6   : > { %v3363_v48 = vpop.xlane.xlu0 %3362 }
 0xac7   : > { %v3370_v49 = vadd.f32 1e-05, %v3368_v47  ;;  %v3367_v50 = vmul.f32 0.03125, %v3363_v48 }
 0xac9   : > { %4422 = vrsqrt.f32 %v3370_v49  ;;  %v3369_v51 = vadd.f32 1e-05, %v3367_v50 }
 0xacb   : > { %4424 = vrsqrt.f32 %v3369_v51 }
 0xad6   : > { %v4423_v52 = vpop.eup %4422 }
 0xad7   : > { %v3374_v54 = vmul.f32 %v4423_v52, %v3358_v41 }
 0xad8   : > { %v4425_v55 = vpop.eup %4424 }
 0xad9   : > { %v3382_v57 = vmul.f32 %v4036_v53, %v3374_v54  ;;  %v3373_v58 = vmul.f32 %v4425_v55, %v3357_v43 }
 0xadb   : > { %v3390_v59 = vadd.f32 %v4037_v56, %v3382_v57  ;;  %v3381_v60 = vmul.f32 %v4036_v53, %v3373_v58  ;;  %3396 = sbr.rel (%p4038_p8) target bundleno = 3177 (0xc69), region = 120 }
 0xadd   : > { %3392 = vst.msk [vmem:[#allocation2 + $0x8] sm:$0xff] %vm1383_vm2, %v3390_v59  ;;  %v3389_v61 = vadd.f32 %v4037_v56, %v3381_v60 }
 0xadf   : > { %3391 = vst.msk [vmem:[#allocation2] sm:$0xff] %vm1383_vm2, %v3389_v61 }
 0xae0   : > { %v3474_v62 = vld [vmem:[%s5133_s28 + $0x18] sm:$0xff]  ;;  %v4467_v1 = vmov 0.0   ;;  %vm4468_vm6 = vmmov 0   ;;  %v3397_v2 = vld [vmem:[%s5134_s18] sm:$0x3]  ;;  %v3473_v3 = vld [vmem:[%s5133_s28 + $0x10] sm:$0xff] }
 0xae1   : > { %4318 = vmatprep.subr.mxu0 %v4467_v1  ;;  %4322 = vmatprep.mubr.msk.f32.mxu0 %vm4468_vm6, %v4467_v1  ;;  %v3472_v4 = vld [vmem:[%s5133_s28 + $0x8] sm:$0xff]  ;;  %v3471_v5 = vld [vmem:[%s5133_s28] sm:$0xff] }
 0xae2   : > { %4319 = vmatpush3.msra.mxu0 %v3390_v59  ;;  %4325 = vmatprep.subr.mxu1 %v4467_v1 }
 0xae3   : > { %4320 = vmatprep.subr.mxu0 %v4467_v1  ;;  %4326 = vmatpush3.msra.mxu1 %v3474_v62 }
 0xae4   : > { %4321 = vmatpush3.msra.mxu0 %v3389_v61  ;;  %4327 = vmatprep.subr.mxu1 %v4467_v1 }
 0xae5   : > { %4323 = vmatmul.mubr.msk.f32.vlgmr.msra.gmra.mxu0 %vm2192_vm4, %v3397_v2  ;;  %4328 = vmatpush3.msra.mxu1 %v3473_v3 }
 0xae6   : > { %4329 = vmatprep.subr.mxu1 %v4467_v1  ;;  %4333 = vmatprep.mubr.msk.f32.mxu1 %vm4468_vm6, %v4467_v1 }
 0xae7   : > { %4330 = vmatpush3.msra.mxu1 %v3472_v4 }
 0xae8   : > { %4331 = vmatprep.subr.mxu1 %v4467_v1 }
 0xae9   : > { %4332 = vmatpush3.msra.mxu1 %v3471_v5 }
 0xba5   : > { %v3467_v6 = vpop.f32.mrf.mxu0 }
 0xba6   : > { %4334 = vmatmul.mubr.msk.f32.vlgmr.msra.gmra.mxu1 %vm1383_vm2, %v3467_v6 }
 0xba7   : > { %v4324_v7 = vpop.f32.mrf.mxu0 }
 0xc66   : > { %v3544_v10 = vpop.f32.mrf.mxu1 }
 0xc67   : > { %3548 = vst [vmem:[%s4714_s20] sm:$0x3] %v3544_v10 }
 0xc68   : > { %v4335_v11 = vpop.f32.mrf.mxu1 }
 0xc69 PF: > { %s5135_s23 = sld [smem:[#allocation6_spill]] }
 0xc6a   : > { %s5136_s4 = sld [smem:[#allocation4_spill]] }
 0xc6b   : > { %s5137_s30 = sld [smem:[#allocation5_spill]] }
 0xc6c   : > { %s5138_s24 = sld [smem:[#allocation7_spill]] }
 0xc6d   : > { %s5139_s25 = sld [smem:[#allocation8_spill]] }
 0xc6f   : > { %s33_s5 = sadd.s32 1, %s5135_s23  }
 0xc70   : > { %p30_p9 = scmp.ge.s32.totalorder %s33_s5, 6  }
 0xc72   :  { %32 = sbr.rel (!%p30_p9) target bundleno = 23 (0x17), region = 204 }

</bundles_post_ra>
